<compile_context>
chip_gen: v7x
topology: tpu7x:2x2x1
jax: 0.10.0
libtpu: 0.0.40
codegen_flags: <defaults>
</compile_context>

<pallas_src>
import functools

import jax
import jax.numpy as jnp
from jax import lax
from jax.experimental import pallas as pl
from jax.experimental.pallas import tpu as pltpu


# ------------------------------ fused kernel --------------------------------

def _fused_mhca_kernel(x_ref, k_ref, v_ref, wq_ref, bq_ref, wproj_ref,
                       bproj_ref, o_ref, o_stage_ref, *, num_heads, scale):
    """One (tq, C) query-row tile of the fused cross-attention forward.

    x_ref       : (TQ, C)  compute-dtype query-row activations
    k_ref/v_ref : (BM, C)  compute-dtype keys / values (projection hoisted out)
    wq_ref      : (C, C)   compute-dtype q weight
    bq_ref      : (1, C)   f32 q bias
    wproj_ref   : (C, C)   compute-dtype output-projection weight
    bproj_ref   : (1, C)   f32 output-projection bias
    o_ref       : (TQ, C)  output tile (original dtype)
    o_stage_ref : (TQ, C)  VMEM scratch staging per-head attention outputs
    """
    f32 = jnp.float32
    cdt = x_ref.dtype                                     # matmul dtype (bf16)

    # Q projection: bf16 operands, f32 accumulation; bias + softmax scale once,
    # then a single cast back to the matmul dtype (no per-head casts).
    q = jnp.dot(x_ref[...], wq_ref[...], preferred_element_type=f32)
    q = ((q + bq_ref[...]) * scale).astype(cdt)           # (TQ, C)

    k = k_ref[...]                                         # (BM, C)
    v = v_ref[...]                                         # (BM, C)

    TQ, C = q.shape
    D = C // num_heads

    for h in range(num_heads):                             # static unroll (H small)
        qh = q[:, h * D:(h + 1) * D]                       # (TQ, D)
        kh = k[:, h * D:(h + 1) * D]                       # (BM, D)
        vh = v[:, h * D:(h + 1) * D]                       # (BM, D)

        # scores = qh @ kh^T (contract last dims; f32 accumulate on the MXU).
        s = lax.dot_general(qh, kh, (((1,), (1,)), ((), ())),
                            preferred_element_type=f32)    # (TQ, BM)
        s = s - jnp.max(s, axis=-1, keepdims=True)
        p = jnp.exp(s)
        p = p * pl.reciprocal(jnp.sum(p, axis=-1, keepdims=True), approx=True)

        oh = jnp.dot(p.astype(cdt), vh, preferred_element_type=f32)   # (TQ, D)

        # Stage this head's output in its lane slice; the output projection is
        # a single K=C matmul after the loop (per-head K=D matmuls waste most
        # of the 256-wide MXU on v6e/v7x).
        o_stage_ref[:, h * D:(h + 1) * D] = oh.astype(cdt)

    out = jnp.dot(o_stage_ref[...], wproj_ref[...], preferred_element_type=f32)
    o_ref[...] = (out + bproj_ref[...]).astype(o_ref.dtype)


# ------------------------------ wrapper --------------------------------------

def seq_parallel_mhca_forward(x, cond, params, *, num_heads, q_tile=256,
                              compute_dtype=jnp.bfloat16,
                              vmem_limit_bytes=None):
    """x: (B, N, C), cond: (B, M, C) -> (B, N, C). sp_size == 1, mask == None."""
    B, N, C = x.shape
    _, M, _ = cond.shape
    assert C % num_heads == 0
    D = C // num_heads
    scale = D ** -0.5
    out_dtype = x.dtype

    BN, BM = B * N, B * M
    x2 = x.reshape(BN, C)
    cond2 = cond.reshape(BM, C)

    # KV projection hoisted out of the kernel: computed exactly once (bf16
    # operands, f32 accumulation); k / v then sit VMEM-resident inside the
    # kernel via constant-index BlockSpecs.
    kv = jnp.dot(cond2.astype(compute_dtype),
                 params["w_kv"].astype(compute_dtype),
                 preferred_element_type=jnp.float32)
    kv = kv + params["b_kv"].astype(jnp.float32)
    k = kv[:, :C].astype(compute_dtype)
    v = kv[:, C:].astype(compute_dtype)

    # --- query-row tiling ------------------------------------------------
    tq = min(q_tile, BN)
    if pl.cdiv(BN, tq) < 2 and BN >= 16:
        # Guarantee >= 2 "parallel" tiles so both v7x TensorCores get work.
        tq = ((BN + 1) // 2 + 7) // 8 * 8
    num_tiles = pl.cdiv(BN, tq)
    BNp = num_tiles * tq

    x2c = x2.astype(compute_dtype)
    if BNp != BN:
        x2c = jnp.pad(x2c, ((0, BNp - BN), (0, 0)))

    itm = jnp.dtype(compute_dtype).itemsize
    flops = (2 * BNp * C * C            # q projection
             + 4 * BNp * BM * C         # scores + PV across all heads
             + 2 * BNp * C * C)         # output projection
    transcendentals = BNp * BM * num_heads
    bytes_accessed = ((BNp * C + 2 * BM * C + 2 * C * C) * itm   # x, k, v, weights
                      + 2 * C * 4                                 # f32 biases
                      + BNp * C * jnp.dtype(out_dtype).itemsize)  # output
    cost = pl.CostEstimate(flops=flops, transcendentals=transcendentals,
                           bytes_accessed=bytes_accessed)

    cp_kwargs = dict(dimension_semantics=("parallel",))
    if vmem_limit_bytes is not None:
        # Re-derive for production shapes: v7x has only 64 MiB physical VMEM
        # (32 MiB scoped default); v5e's scoped default is 16 MiB of 128 MiB.
        cp_kwargs["vmem_limit_bytes"] = vmem_limit_bytes
    compiler_params = pltpu.CompilerParams(**cp_kwargs)

    kernel = functools.partial(_fused_mhca_kernel,
                               num_heads=num_heads, scale=scale)

    out = pl.pallas_call(
        kernel,
        out_shape=jax.ShapeDtypeStruct((BNp, C), out_dtype),
        grid=(num_tiles,),
        in_specs=[
            pl.BlockSpec((tq, C), lambda i: (i, 0)),     # x rows (tiled)
            pl.BlockSpec((BM, C), lambda i: (0, 0)),     # k (resident)
            pl.BlockSpec((BM, C), lambda i: (0, 0)),     # v (resident)
            pl.BlockSpec((C, C), lambda i: (0, 0)),      # w_q
            pl.BlockSpec((1, C), lambda i: (0, 0)),      # b_q (f32)
            pl.BlockSpec((C, C), lambda i: (0, 0)),      # w_proj
            pl.BlockSpec((1, C), lambda i: (0, 0)),      # b_proj (f32)
        ],
        out_specs=pl.BlockSpec((tq, C), lambda i: (i, 0)),
        scratch_shapes=[pltpu.VMEM((tq, C), compute_dtype)],
        compiler_params=compiler_params,
        cost_estimate=cost,
    )(x2c, k, v,
      params["w_q"].astype(compute_dtype),
      params["b_q"].reshape(1, C).astype(jnp.float32),
      params["w_proj"].astype(compute_dtype),
      params["b_proj"].reshape(1, C).astype(jnp.float32))

    if BNp != BN:
        out = out[:BN]
    return out.reshape(B, N, C)


# ------------------------------ pure-JAX reference ---------------------------

def reference_forward(x, cond, params, *, num_heads):
    B, N, C = x.shape
    _, M, _ = cond.shape
    D = C // num_heads
    scale = D ** -0.5

    q = (x.reshape(-1, C) @ params["w_q"] + params["b_q"])
    kv = (cond.reshape(-1, C) @ params["w_kv"] + params["b_kv"])

    # xformers layout with mask=None: batch-flattened sequences, full attention.
    qh = q.reshape(B * N, num_heads, D).transpose(1, 0, 2)          # (H, BN, D)
    kh = kv[:, :C].reshape(B * M, num_heads, D).transpose(1, 0, 2)  # (H, BM, D)
    vh = kv[:, C:].reshape(B * M, num_heads, D).transpose(1, 0, 2)

    s = (qh * scale) @ jnp.swapaxes(kh, -1, -2)                     # (H, BN, BM)
    p = jax.nn.softmax(s.astype(jnp.float32), axis=-1).astype(x.dtype)
    o = (p @ vh).transpose(1, 0, 2).reshape(B * N, C)
    out = o @ params["w_proj"] + params["b_proj"]
    return out.reshape(B, N, C)


# ----------------------------------- main ------------------------------------

if __name__ == "__main__":
    B = 2            # batch
    N = 128          # query sequence length (per device; sp_size = 1)
    M = 64           # cond (kv) sequence length
    C = 128          # d_model  (lane-dense last dim)
    num_heads = 4    # head_dim = 32

    key = jax.random.PRNGKey(0)
    k1, k2, k3, k4, k5, k6, k7, k8 = jax.random.split(key, 8)

    x = jax.random.normal(k1, (B, N, C), jnp.float32)
    cond = jax.random.normal(k2, (B, M, C), jnp.float32)

    params = {
        # nn.Linear(d_model, d_model): weights stored as (in, out)
        "w_q": 0.02 * jax.random.normal(k3, (C, C), jnp.float32),
        "b_q": 0.01 * jax.random.normal(k4, (C,), jnp.float32),
        # nn.Linear(d_model, 2*d_model)
        "w_kv": 0.02 * jax.random.normal(k5, (C, 2 * C), jnp.float32),
        "b_kv": 0.01 * jax.random.normal(k6, (2 * C,), jnp.float32),
        # nn.Linear(d_model, d_model)
        "w_proj": 0.02 * jax.random.normal(k7, (C, C), jnp.float32),
        "b_proj": 0.01 * jax.random.normal(k8, (C,), jnp.float32),
    }

    out = seq_parallel_mhca_forward(x, cond, params, num_heads=num_heads)
    out = jax.block_until_ready(out)

    ref = reference_forward(x, cond, params, num_heads=num_heads)
    err = float(jnp.max(jnp.abs(out - ref)))
    assert jnp.allclose(out, ref, atol=2e-2, rtol=2e-2), f"max abs err = {err}"

    print("KERNEL_OK")
</pallas_src>

<mosaic_0001>
module attributes {stable_mosaic.version = 11 : i64} {
  func.func @_fused_mhca_kernel(%arg0: i32, %arg1: memref<128x128xbf16, #tpu.memory_space<vmem>>, %arg2: memref<128x128xbf16, #tpu.memory_space<vmem>>, %arg3: memref<128x128xbf16, #tpu.memory_space<vmem>>, %arg4: memref<128x128xbf16, #tpu.memory_space<vmem>>, %arg5: memref<1x128xf32, #tpu.memory_space<vmem>>, %arg6: memref<128x128xbf16, #tpu.memory_space<vmem>>, %arg7: memref<1x128xf32, #tpu.memory_space<vmem>>, %arg8: memref<128x128xf32, #tpu.memory_space<vmem>>, %arg9: memref<128x128xbf16, #tpu.memory_space<vmem>>) attributes {dimension_semantics = [#tpu.dimension_semantics<parallel>], iteration_bounds = array<i64: 2>, scalar_prefetch = 0 : i64, scratch_operands = 1 : i64, tpu.core_type = #tpu.core_type<tc>, window_params = [{transform_indices = @transform_0, window_bounds = array<i64: 128, 128>}, {pipeline_mode = #tpu.pipeline_mode<synchronous>, transform_indices = @transform_1, window_bounds = array<i64: 128, 128>}, {pipeline_mode = #tpu.pipeline_mode<synchronous>, transform_indices = @transform_2, window_bounds = array<i64: 128, 128>}, {pipeline_mode = #tpu.pipeline_mode<synchronous>, transform_indices = @transform_3, window_bounds = array<i64: 128, 128>}, {pipeline_mode = #tpu.pipeline_mode<synchronous>, transform_indices = @transform_4, window_bounds = array<i64: 1, 128>}, {pipeline_mode = #tpu.pipeline_mode<synchronous>, transform_indices = @transform_5, window_bounds = array<i64: 128, 128>}, {pipeline_mode = #tpu.pipeline_mode<synchronous>, transform_indices = @transform_6, window_bounds = array<i64: 1, 128>}, {transform_indices = @transform_7, window_bounds = array<i64: 128, 128>}]} {
    %c0 = arith.constant 0 : index
    %c0_0 = arith.constant 0 : index
    %0 = vector.load %arg1[%c0, %c0_0] : memref<128x128xbf16, #tpu.memory_space<vmem>>, vector<128x128xbf16>
    %c0_1 = arith.constant 0 : index
    %c0_2 = arith.constant 0 : index
    %1 = vector.load %arg4[%c0_1, %c0_2] : memref<128x128xbf16, #tpu.memory_space<vmem>>, vector<128x128xbf16>
    %cst = arith.constant dense<0.000000e+00> : vector<128x128xf32>
    %2 = tpu.matmul %0, %1, %cst {dimension_numbers = #tpu.dot_dimension_numbers<[1], [0], [0], [1], [0, 0, 1, 1], [], []>} : vector<128x128xbf16>, vector<128x128xbf16>, vector<128x128xf32> -> vector<128x128xf32>
    %c0_3 = arith.constant 0 : index
    %c0_4 = arith.constant 0 : index
    %3 = vector.load %arg5[%c0_3, %c0_4] : memref<1x128xf32, #tpu.memory_space<vmem>>, vector<1x128xf32>
    %4 = vector.broadcast %3 : vector<1x128xf32> to vector<128x128xf32>
    %5 = arith.addf %2, %4 : vector<128x128xf32>
    %cst_5 = arith.constant 0.176776692 : f32
    %6 = vector.broadcast %cst_5 : f32 to vector<128x128xf32>
    %7 = arith.mulf %5, %6 : vector<128x128xf32>
    %8 = arith.truncf %7 : vector<128x128xf32> to vector<128x128xbf16>
    %c0_6 = arith.constant 0 : index
    %c0_7 = arith.constant 0 : index
    %9 = vector.load %arg2[%c0_6, %c0_7] : memref<128x128xbf16, #tpu.memory_space<vmem>>, vector<128x128xbf16>
    %c0_8 = arith.constant 0 : index
    %c0_9 = arith.constant 0 : index
    %10 = vector.load %arg3[%c0_8, %c0_9] : memref<128x128xbf16, #tpu.memory_space<vmem>>, vector<128x128xbf16>
    %11 = vector.extract_strided_slice %8 {offsets = [0, 0], sizes = [128, 32], strides = [1, 1]} : vector<128x128xbf16> to vector<128x32xbf16>
    %12 = vector.extract_strided_slice %9 {offsets = [0, 0], sizes = [128, 32], strides = [1, 1]} : vector<128x128xbf16> to vector<128x32xbf16>
    %13 = vector.extract_strided_slice %10 {offsets = [0, 0], sizes = [128, 32], strides = [1, 1]} : vector<128x128xbf16> to vector<128x32xbf16>
    %cst_10 = arith.constant dense<0.000000e+00> : vector<128x128xf32>
    %14 = tpu.matmul %11, %12, %cst_10 {dimension_numbers = #tpu.dot_dimension_numbers<[1], [1], [0], [0], [0, 0, 1, 0], [], []>} : vector<128x32xbf16>, vector<128x32xbf16>, vector<128x128xf32> -> vector<128x128xf32>
    %cst_11 = arith.constant dense<0xFF800000> : vector<128xf32>
    %15 = vector.multi_reduction <maximumf>, %14, %cst_11 [1] : vector<128x128xf32> to vector<128xf32>
    %16 = vector.shape_cast %15 : vector<128xf32> to vector<128x1xf32>
    %17 = vector.broadcast %16 : vector<128x1xf32> to vector<128x128xf32>
    %18 = arith.subf %14, %17 : vector<128x128xf32>
    %19 = math.exp %18 : vector<128x128xf32>
    %cst_12 = arith.constant dense<0.000000e+00> : vector<128xf32>
    %20 = vector.multi_reduction <add>, %19, %cst_12 [1] : vector<128x128xf32> to vector<128xf32>
    %21 = vector.shape_cast %20 : vector<128xf32> to vector<128x1xf32>
    %22 = tpu.reciprocal %21 {approx = true} : vector<128x1xf32> -> vector<128x1xf32>
    %23 = vector.broadcast %22 : vector<128x1xf32> to vector<128x128xf32>
    %24 = arith.mulf %19, %23 : vector<128x128xf32>
    %25 = arith.truncf %24 : vector<128x128xf32> to vector<128x128xbf16>
    %cst_13 = arith.constant dense<0.000000e+00> : vector<128x32xf32>
    %26 = tpu.matmul %25, %13, %cst_13 {dimension_numbers = #tpu.dot_dimension_numbers<[1], [0], [0], [1], [0, 0, 1, 1], [], []>} : vector<128x128xbf16>, vector<128x32xbf16>, vector<128x32xf32> -> vector<128x32xf32>
    %27 = arith.truncf %26 : vector<128x32xf32> to vector<128x32xbf16>
    %c0_14 = arith.constant 0 : index
    %c0_15 = arith.constant 0 : index
    %28 = vector.load %arg9[%c0_14, %c0_15] : memref<128x128xbf16, #tpu.memory_space<vmem>>, vector<128x32xbf16>
    tpu.vector_store %arg9[%c0_14, %c0_15], %27 {strides = array<i32>} : memref<128x128xbf16, #tpu.memory_space<vmem>>, vector<128x32xbf16>,
    %29 = vector.extract_strided_slice %8 {offsets = [0, 32], sizes = [128, 32], strides = [1, 1]} : vector<128x128xbf16> to vector<128x32xbf16>
    %30 = vector.extract_strided_slice %9 {offsets = [0, 32], sizes = [128, 32], strides = [1, 1]} : vector<128x128xbf16> to vector<128x32xbf16>
    %31 = vector.extract_strided_slice %10 {offsets = [0, 32], sizes = [128, 32], strides = [1, 1]} : vector<128x128xbf16> to vector<128x32xbf16>
    %cst_16 = arith.constant dense<0.000000e+00> : vector<128x128xf32>
    %32 = tpu.matmul %29, %30, %cst_16 {dimension_numbers = #tpu.dot_dimension_numbers<[1], [1], [0], [0], [0, 0, 1, 0], [], []>} : vector<128x32xbf16>, vector<128x32xbf16>, vector<128x128xf32> -> vector<128x128xf32>
    %cst_17 = arith.constant dense<0xFF800000> : vector<128xf32>
    %33 = vector.multi_reduction <maximumf>, %32, %cst_17 [1] : vector<128x128xf32> to vector<128xf32>
    %34 = vector.shape_cast %33 : vector<128xf32> to vector<128x1xf32>
    %35 = vector.broadcast %34 : vector<128x1xf32> to vector<128x128xf32>
    %36 = arith.subf %32, %35 : vector<128x128xf32>
    %37 = math.exp %36 : vector<128x128xf32>
    %cst_18 = arith.constant dense<0.000000e+00> : vector<128xf32>
    %38 = vector.multi_reduction <add>, %37, %cst_18 [1] : vector<128x128xf32> to vector<128xf32>
    %39 = vector.shape_cast %38 : vector<128xf32> to vector<128x1xf32>
    %40 = tpu.reciprocal %39 {approx = true} : vector<128x1xf32> -> vector<128x1xf32>
    %41 = vector.broadcast %40 : vector<128x1xf32> to vector<128x128xf32>
    %42 = arith.mulf %37, %41 : vector<128x128xf32>
    %43 = arith.truncf %42 : vector<128x128xf32> to vector<128x128xbf16>
    %cst_19 = arith.constant dense<0.000000e+00> : vector<128x32xf32>
    %44 = tpu.matmul %43, %31, %cst_19 {dimension_numbers = #tpu.dot_dimension_numbers<[1], [0], [0], [1], [0, 0, 1, 1], [], []>} : vector<128x128xbf16>, vector<128x32xbf16>, vector<128x32xf32> -> vector<128x32xf32>
    %45 = arith.truncf %44 : vector<128x32xf32> to vector<128x32xbf16>
    %c0_20 = arith.constant 0 : index
    %c32 = arith.constant 32 : index
    %46 = vector.load %arg9[%c0_20, %c32] : memref<128x128xbf16, #tpu.memory_space<vmem>>, vector<128x32xbf16>
    tpu.vector_store %arg9[%c0_20, %c32], %45 {strides = array<i32>} : memref<128x128xbf16, #tpu.memory_space<vmem>>, vector<128x32xbf16>,
    %47 = vector.extract_strided_slice %8 {offsets = [0, 64], sizes = [128, 32], strides = [1, 1]} : vector<128x128xbf16> to vector<128x32xbf16>
    %48 = vector.extract_strided_slice %9 {offsets = [0, 64], sizes = [128, 32], strides = [1, 1]} : vector<128x128xbf16> to vector<128x32xbf16>
    %49 = vector.extract_strided_slice %10 {offsets = [0, 64], sizes = [128, 32], strides = [1, 1]} : vector<128x128xbf16> to vector<128x32xbf16>
    %cst_21 = arith.constant dense<0.000000e+00> : vector<128x128xf32>
    %50 = tpu.matmul %47, %48, %cst_21 {dimension_numbers = #tpu.dot_dimension_numbers<[1], [1], [0], [0], [0, 0, 1, 0], [], []>} : vector<128x32xbf16>, vector<128x32xbf16>, vector<128x128xf32> -> vector<128x128xf32>
    %cst_22 = arith.constant dense<0xFF800000> : vector<128xf32>
    %51 = vector.multi_reduction <maximumf>, %50, %cst_22 [1] : vector<128x128xf32> to vector<128xf32>
    %52 = vector.shape_cast %51 : vector<128xf32> to vector<128x1xf32>
    %53 = vector.broadcast %52 : vector<128x1xf32> to vector<128x128xf32>
    %54 = arith.subf %50, %53 : vector<128x128xf32>
    %55 = math.exp %54 : vector<128x128xf32>
    %cst_23 = arith.constant dense<0.000000e+00> : vector<128xf32>
    %56 = vector.multi_reduction <add>, %55, %cst_23 [1] : vector<128x128xf32> to vector<128xf32>
    %57 = vector.shape_cast %56 : vector<128xf32> to vector<128x1xf32>
    %58 = tpu.reciprocal %57 {approx = true} : vector<128x1xf32> -> vector<128x1xf32>
    %59 = vector.broadcast %58 : vector<128x1xf32> to vector<128x128xf32>
    %60 = arith.mulf %55, %59 : vector<128x128xf32>
    %61 = arith.truncf %60 : vector<128x128xf32> to vector<128x128xbf16>
    %cst_24 = arith.constant dense<0.000000e+00> : vector<128x32xf32>
    %62 = tpu.matmul %61, %49, %cst_24 {dimension_numbers = #tpu.dot_dimension_numbers<[1], [0], [0], [1], [0, 0, 1, 1], [], []>} : vector<128x128xbf16>, vector<128x32xbf16>, vector<128x32xf32> -> vector<128x32xf32>
    %63 = arith.truncf %62 : vector<128x32xf32> to vector<128x32xbf16>
    %c0_25 = arith.constant 0 : index
    %c64 = arith.constant 64 : index
    %64 = vector.load %arg9[%c0_25, %c64] : memref<128x128xbf16, #tpu.memory_space<vmem>>, vector<128x32xbf16>
    tpu.vector_store %arg9[%c0_25, %c64], %63 {strides = array<i32>} : memref<128x128xbf16, #tpu.memory_space<vmem>>, vector<128x32xbf16>,
    %65 = vector.extract_strided_slice %8 {offsets = [0, 96], sizes = [128, 32], strides = [1, 1]} : vector<128x128xbf16> to vector<128x32xbf16>
    %66 = vector.extract_strided_slice %9 {offsets = [0, 96], sizes = [128, 32], strides = [1, 1]} : vector<128x128xbf16> to vector<128x32xbf16>
    %67 = vector.extract_strided_slice %10 {offsets = [0, 96], sizes = [128, 32], strides = [1, 1]} : vector<128x128xbf16> to vector<128x32xbf16>
    %cst_26 = arith.constant dense<0.000000e+00> : vector<128x128xf32>
    %68 = tpu.matmul %65, %66, %cst_26 {dimension_numbers = #tpu.dot_dimension_numbers<[1], [1], [0], [0], [0, 0, 1, 0], [], []>} : vector<128x32xbf16>, vector<128x32xbf16>, vector<128x128xf32> -> vector<128x128xf32>
    %cst_27 = arith.constant dense<0xFF800000> : vector<128xf32>
    %69 = vector.multi_reduction <maximumf>, %68, %cst_27 [1] : vector<128x128xf32> to vector<128xf32>
    %70 = vector.shape_cast %69 : vector<128xf32> to vector<128x1xf32>
    %71 = vector.broadcast %70 : vector<128x1xf32> to vector<128x128xf32>
    %72 = arith.subf %68, %71 : vector<128x128xf32>
    %73 = math.exp %72 : vector<128x128xf32>
    %cst_28 = arith.constant dense<0.000000e+00> : vector<128xf32>
    %74 = vector.multi_reduction <add>, %73, %cst_28 [1] : vector<128x128xf32> to vector<128xf32>
    %75 = vector.shape_cast %74 : vector<128xf32> to vector<128x1xf32>
    %76 = tpu.reciprocal %75 {approx = true} : vector<128x1xf32> -> vector<128x1xf32>
    %77 = vector.broadcast %76 : vector<128x1xf32> to vector<128x128xf32>
    %78 = arith.mulf %73, %77 : vector<128x128xf32>
    %79 = arith.truncf %78 : vector<128x128xf32> to vector<128x128xbf16>
    %cst_29 = arith.constant dense<0.000000e+00> : vector<128x32xf32>
    %80 = tpu.matmul %79, %67, %cst_29 {dimension_numbers = #tpu.dot_dimension_numbers<[1], [0], [0], [1], [0, 0, 1, 1], [], []>} : vector<128x128xbf16>, vector<128x32xbf16>, vector<128x32xf32> -> vector<128x32xf32>
    %81 = arith.truncf %80 : vector<128x32xf32> to vector<128x32xbf16>
    %c0_30 = arith.constant 0 : index
    %c96 = arith.constant 96 : index
    %82 = vector.load %arg9[%c0_30, %c96] : memref<128x128xbf16, #tpu.memory_space<vmem>>, vector<128x32xbf16>
    tpu.vector_store %arg9[%c0_30, %c96], %81 {strides = array<i32>} : memref<128x128xbf16, #tpu.memory_space<vmem>>, vector<128x32xbf16>,
    %c0_31 = arith.constant 0 : index
    %c0_32 = arith.constant 0 : index
    %83 = vector.load %arg9[%c0_31, %c0_32] : memref<128x128xbf16, #tpu.memory_space<vmem>>, vector<128x128xbf16>
    %c0_33 = arith.constant 0 : index
    %c0_34 = arith.constant 0 : index
    %84 = vector.load %arg6[%c0_33, %c0_34] : memref<128x128xbf16, #tpu.memory_space<vmem>>, vector<128x128xbf16>
    %cst_35 = arith.constant dense<0.000000e+00> : vector<128x128xf32>
    %85 = tpu.matmul %83, %84, %cst_35 {dimension_numbers = #tpu.dot_dimension_numbers<[1], [0], [0], [1], [0, 0, 1, 1], [], []>} : vector<128x128xbf16>, vector<128x128xbf16>, vector<128x128xf32> -> vector<128x128xf32>
    %c0_36 = arith.constant 0 : index
    %c0_37 = arith.constant 0 : index
    %86 = vector.load %arg7[%c0_36, %c0_37] : memref<1x128xf32, #tpu.memory_space<vmem>>, vector<1x128xf32>
    %87 = vector.broadcast %86 : vector<1x128xf32> to vector<128x128xf32>
    %88 = arith.addf %85, %87 : vector<128x128xf32>
    %c0_38 = arith.constant 0 : index
    %c0_39 = arith.constant 0 : index
    %89 = vector.load %arg8[%c0_38, %c0_39] : memref<128x128xf32, #tpu.memory_space<vmem>>, vector<128x128xf32>
    tpu.vector_store %arg8[%c0_38, %c0_39], %88 {strides = array<i32>} : memref<128x128xf32, #tpu.memory_space<vmem>>, vector<128x128xf32>,
    return
  }
  func.func @transform_0(%arg0: i32) -> (i32, i32) {
    %c0_i32 = arith.constant 0 : i32
    %c0_i32_0 = arith.constant 0 : i32
    return %arg0, %c0_i32 : i32, i32
  }
  func.func @transform_1(%arg0: i32) -> (i32, i32) {
    %c0_i32 = arith.constant 0 : i32
    %c0_i32_0 = arith.constant 0 : i32
    %c0_i32_1 = arith.constant 0 : i32
    return %c0_i32, %c0_i32_0 : i32, i32
  }
  func.func @transform_2(%arg0: i32) -> (i32, i32) {
    %c0_i32 = arith.constant 0 : i32
    %c0_i32_0 = arith.constant 0 : i32
    %c0_i32_1 = arith.constant 0 : i32
    return %c0_i32, %c0_i32_0 : i32, i32
  }
  func.func @transform_3(%arg0: i32) -> (i32, i32) {
    %c0_i32 = arith.constant 0 : i32
    %c0_i32_0 = arith.constant 0 : i32
    %c0_i32_1 = arith.constant 0 : i32
    return %c0_i32, %c0_i32_0 : i32, i32
  }
  func.func @transform_4(%arg0: i32) -> (i32, i32) {
    %c0_i32 = arith.constant 0 : i32
    %c0_i32_0 = arith.constant 0 : i32
    %c0_i32_1 = arith.constant 0 : i32
    return %c0_i32, %c0_i32_0 : i32, i32
  }
  func.func @transform_5(%arg0: i32) -> (i32, i32) {
    %c0_i32 = arith.constant 0 : i32
    %c0_i32_0 = arith.constant 0 : i32
    %c0_i32_1 = arith.constant 0 : i32
    return %c0_i32, %c0_i32_0 : i32, i32
  }
  func.func @transform_6(%arg0: i32) -> (i32, i32) {
    %c0_i32 = arith.constant 0 : i32
    %c0_i32_0 = arith.constant 0 : i32
    %c0_i32_1 = arith.constant 0 : i32
    return %c0_i32, %c0_i32_0 : i32, i32
  }
  func.func @transform_7(%arg0: i32) -> (i32, i32) {
    %c0_i32 = arith.constant 0 : i32
    %c0_i32_0 = arith.constant 0 : i32
    return %arg0, %c0_i32 : i32, i32
  }
}

</mosaic_0001>

<bundles_post_ra>
// kernel: tpu_custom_call.1
= control target key start
LH: loop header
LB: loop body
LE: loop exit
PB: predicated region body
PF: predicated region fallthrough
CT: control target
= control target key end

     0   :  { %12 = vsyncpa [#allocation4], 0  ;;  %s5570_s0 = inlined_call_operand.hbm [shape: bf16[256,128], index: 0, kind: input, shape index: {}]   ;;  %s5571_s1 = inlined_call_operand.hbm [shape: bf16[128,128], index: 1, kind: input, shape index: {}]   ;;  %s5572_s2 = inlined_call_operand.hbm [shape: bf16[128,128], index: 2, kind: input, shape index: {}]   ;;  %s5573_s3 = inlined_call_operand.hbm [shape: bf16[128,128], index: 3, kind: input, shape index: {}]   ;;  %s5574_s4 = inlined_call_operand.vmem [shape: f32[1,128], index: 4, kind: input, shape index: {}]   ;;  %s5575_s5 = inlined_call_operand.hbm [shape: bf16[128,128], index: 5, kind: input, shape index: {}]   ;;  %s5576_s6 = inlined_call_operand.vmem [shape: f32[1,128], index: 6, kind: input, shape index: {}]   ;;  %s5577_s7 = inlined_call_operand.hbm [shape: f32[256,128], index: 7, kind: output, shape index: {}]  }
   0x1   :  { %14 = vsyncpa [#allocation4 + $0x1], 0 }
   0x2   :  { %15 = vsyncpa [#allocation7], 0 }
   0x3   :  { %16 = vsyncpa [#allocation10], 0 }
   0x4   :  { %17 = vsyncpa [#allocation5], 0 }
   0x5   :  { %19 = vsyncpa [#allocation5 + $0x1], 0  ;;  %s4254_s24 = smov 0   ;;  %s4256_s25 = smov 0  }
   0x6   :  { %s4258_s26 = smov 0   ;;  %s4260_s27 = smov 0  }
   0x7 LB: > { %s4275_s28 = sadd.s32 4294967295, %s4199_s27   ;;  %s2967_s29 = sadd.s32 4294967294, %s4199_s27   ;;  %s4199_s27 = sphi %s4260_s27, %s5622_s27   ;;  %s4195_s26 = sphi %s4258_s26, %s5621_s26   ;;  %s4191_s25 = sphi %s4256_s25, %s5620_s25   ;;  %s4187_s24 = sphi %s4254_s24, %s5619_s24  }
   0x8   : > { %p45_p0 = scmp.ne.s32.totalorder %s4191_s25, %s4187_s24  ;;  %p5578_p1 = scmp.eq.s32.totalorder %s4275_s28, 0 }
   0x9   : > { %p201_p3 = scmp.eq.s32.totalorder %s2967_s29, 1  ;;  %p2968_p5 = scmp.ge.s32.totalorder %s4199_s27, 1 }
   0xa   : > { %p4284_p4 = por %p5578_p1, %p45_p0  ;;  %p208_p7 = scmp.lt.s32.totalorder %s4199_s27, 3 }
   0xb   : > { %p4289_p6 = por %p201_p3, %p45_p0  ;;  %s4201_s10 = smov [#allocation6]  }
   0xc   : > { %s5583_s30 = scalar_select %p4284_p4, 1, 0 }
   0xd   : > { %s5584_s8 = scalar_select %p4289_p6, 1, 0 }
   0xe   : > { %p4294_p8 = pnand %p2968_p5, %p208_p7  ;;  %s220_s11 = sshll.u32 %s4201_s10, 4  ;;  %s4298_s11 = int_to_ptr.vmem [resolvable:$true] %s220_s11 }
   0xf   : > { %5585 = sst [smem:[#allocation17_spill]] %s5584_s8  ;;  %s4202_s13 = smov [#allocation9]  }
  0x10   : > { %s5586_s9 = scalar_select %p4294_p8, 1, 0 }
  0x11   : > { %p3597_p9 = pneg %p4294_p8  ;;  %s246_s14 = sshll.u32 %s4202_s13, 4  ;;  %s4309_s14 = int_to_ptr.vmem [resolvable:$true] %s246_s14 }
  0x12   : > { %s4203_s15 = smov [#allocation8]   ;;  %s3983_s19 = scalar_lea.hbm %s5571_s1, 1024 }
  0x13   : > { %p4305_p11 = pnand %p3597_p9, %p5578_p1  ;;  %s4311_s16 = sshll.u32 %s4203_s15, 4  ;;  %s234_s16 = int_to_ptr.vmem [resolvable:$true] %s4311_s16 }
  0x14   : > { %p3984_p12 = scmp.ne.s32.totalorder %s5571_s1, %s3983_s19  ;;  %p3990_p5 = scmp.lt.u32.totalorder %s3983_s19, %s5571_s1 }
  0x15   : > { %p4321_p13 = pneg %p4305_p11 }
  0x17   : > { %p3986_p0 = pnand %p4321_p13, %p3984_p12 }
  0x19   : > { %p3987_p3 = pneg %p3986_p0 }
  0x1b   : > { %p3992_p7 = pnand %p3990_p5, %p3987_p3 }
  0x1d   : > { %3995 = shalt.err (!%p3992_p7)
}
  0x1e   : > { %s3996_s10 = scalar_lea.vmem %s4298_s11, 1024  ;;  %p4004_p2 = scmp.lt.s32.totalorder %s4298_s11, %s4298_s11 }
  0x1f   : > { %p3997_p9 = scmp.ne.s32.totalorder %s4298_s11, %s3996_s10  ;;  %p4005_p6 = scmp.lt.s32.totalorder %s3996_s10, %s3996_s10 }
  0x21   : > { %p3999_p10 = pnand %p3997_p9, %p4321_p13  ;;  %p4006_p12 = por %p4005_p6, %p4004_p2 }
  0x23   : > { %p4000_p1 = pneg %p3999_p10 }
  0x25   : > { %p4007_p0 = pnand %p4006_p12, %p4000_p1 }
  0x27   : > { %4010 = shalt.err (!%p4007_p0)
}
  0x28   : > { %s4204_s13 = smov 64   ;;  %s4205_s15 = smov 4  }
  0x29   : > { %3600 = dma.hbm_to_vmem [thread:$0]  (!%p4305_p11), %s5571_s1, 1024, %s4298_s11, [#allocation7], %s4204_s13, %s4204_s13, %s4205_s15  }
  0x2a   : > { %s4011_s21 = scalar_lea.hbm %s5573_s3, 1024 }
  0x2b   : > { %p4012_p1 = scmp.ne.s32.totalorder %s5573_s3, %s4011_s21  ;;  %p4018_p10 = scmp.lt.u32.totalorder %s4011_s21, %s5573_s3 }
  0x2d   : > { %p4014_p2 = pnand %p4012_p1, %p4321_p13 }
  0x2f   : > { %p4015_p6 = pneg %p4014_p2 }
  0x31   : > { %p4020_p3 = pnand %p4018_p10, %p4015_p6 }
  0x33   : > { %4023 = shalt.err (!%p4020_p3)
}
  0x34   : > { %s4024_s11 = scalar_lea.vmem %s4309_s14, 1024  ;;  %p4032_p12 = scmp.lt.s32.totalorder %s4309_s14, %s4309_s14 }
  0x35   : > { %p4025_p5 = scmp.ne.s32.totalorder %s4309_s14, %s4024_s11  ;;  %p4033_p0 = scmp.lt.s32.totalorder %s4024_s11, %s4024_s11 }
  0x37   : > { %p4027_p7 = pnand %p4025_p5, %p4321_p13  ;;  %p4034_p1 = por %p4033_p0, %p4032_p12 }
  0x39   : > { %p4028_p9 = pneg %p4027_p7 }
  0x3b   : > { %p4035_p2 = pnand %p4034_p1, %p4028_p9 }
  0x3d   : > { %4038 = shalt.err (!%p4035_p2)
}
  0x3e   : > { %3606 = dma.hbm_to_vmem [thread:$0]  (!%p4305_p11), %s5573_s3, 1024, %s4309_s14, [#allocation10], %s4204_s13, %s4204_s13, %s4205_s15  }
  0x3f   : > { %s4039_s20 = scalar_lea.hbm %s5572_s2, 1024 }
  0x40   : > { %p4040_p6 = scmp.ne.s32.totalorder %s5572_s2, %s4039_s20  ;;  %p4046_p5 = scmp.lt.u32.totalorder %s4039_s20, %s5572_s2 }
  0x42   : > { %p4042_p10 = pnand %p4040_p6, %p4321_p13 }
  0x44   : > { %p4043_p3 = pneg %p4042_p10 }
  0x46   : > { %p4048_p7 = pnand %p4046_p5, %p4043_p3 }
  0x48   : > { %4051 = shalt.err (!%p4048_p7)
}
  0x49   : > { %s4052_s11 = scalar_lea.vmem %s234_s16, 1024  ;;  %p4060_p1 = scmp.lt.s32.totalorder %s234_s16, %s234_s16 }
  0x4a   : > { %p4053_p9 = scmp.ne.s32.totalorder %s234_s16, %s4052_s11  ;;  %p4061_p2 = scmp.lt.s32.totalorder %s4052_s11, %s4052_s11 }
  0x4c   : > { %p4055_p12 = pnand %p4053_p9, %p4321_p13  ;;  %p4062_p4 = por %p4061_p2, %p4060_p1 }
  0x4e   : > { %p4056_p0 = pneg %p4055_p12 }
  0x50   : > { %p4063_p8 = pnand %p4062_p4, %p4056_p0 }
  0x52   : > { %4066 = shalt.err (!%p4063_p8)
}
  0x53   : > { %3603 = dma.hbm_to_vmem [thread:$0]  (!%p4305_p11), %s5572_s2, 1024, %s234_s16, [#allocation7], %s4204_s13, %s4204_s13, %s4205_s15  }
  0x54   : > { %s4206_s17 = smov [#allocation11]   ;;  %s4067_s21 = scalar_lea.hbm %s5575_s5, 1024 }
  0x55   : > { %s262_s18 = sshll.u32 %s4206_s17, 4  ;;  %p4068_p4 = scmp.ne.s32.totalorder %s5575_s5, %s4067_s21  ;;  %s263_s18 = int_to_ptr.vmem [resolvable:$true] %s262_s18 }
  0x56   : > { %p4074_p10 = scmp.lt.u32.totalorder %s4067_s21, %s5575_s5 }
  0x57   : > { %p4070_p8 = pnand %p4068_p4, %p4321_p13 }
  0x59   : > { %p4071_p6 = pneg %p4070_p8 }
  0x5b   : > { %p4076_p3 = pnand %p4074_p10, %p4071_p6 }
  0x5d   : > { %4079 = shalt.err (!%p4076_p3)
}
  0x5e   : > { %s4080_s16 = scalar_lea.vmem %s263_s18, 1024  ;;  %p4088_p12 = scmp.lt.s32.totalorder %s263_s18, %s263_s18 }
  0x5f   : > { %p4081_p5 = scmp.ne.s32.totalorder %s263_s18, %s4080_s16  ;;  %p4089_p0 = scmp.lt.s32.totalorder %s4080_s16, %s4080_s16 }
  0x61   : > { %p4083_p7 = pnand %p4081_p5, %p4321_p13  ;;  %p4090_p1 = por %p4089_p0, %p4088_p12 }
  0x63   : > { %p4084_p9 = pneg %p4083_p7 }
  0x65   : > { %p4091_p2 = pnand %p4090_p1, %p4084_p9 }
  0x67   : > { %4094 = shalt.err (!%p4091_p2)
}
  0x68   : > { %3609 = dma.hbm_to_vmem [thread:$0]  (!%p4305_p11), %s5575_s5, 1024, %s263_s18, [#allocation10], %s4204_s13, %s4204_s13, %s4205_s15  }
  0x69   : > { %s4415_s22 = sadd.s32 1, %s4199_s27   ;;  %s32_s12 = sadd.s32 1, %s4195_s26 }
  0x6a   : > { %s29_s17 = ssub.s32 %s4199_s27, %s4415_s22  ;;  %p39_p13 = scmp.ne.s32.totalorder %s4195_s26, %s4191_s25 }
  0x6b   : > { %p30_p4 = scmp.eq.s32.totalorder %s29_s17, 0  ;;  %p40_p8 = scmp.eq.s32.totalorder %s4199_s27, 0 }
  0x6c   : > { %p5589_p6 = scmp.eq.s32.totalorder %s4275_s28, 1  ;;  %p3622_p3 = scmp.lt.s32.totalorder %s4199_s27, 2 }
  0x6d   : > { %s4431_s20 = scalar_select %p30_p4, %s4195_s26, %s32_s12  }
  0x6e   : > { %p4425_p10 = por %p5589_p6, %p39_p13  ;;  %p41_p5 = por %p40_p8, %p39_p13 }
  0x6f   : > { %s279_s21 = sand.u32 1, %s4195_s26   ;;  %s3063_s18 = sshll.u32 %s4199_s27, 10 }
  0x70   : > { %s2974_s23 = sshll.u32 %s279_s21, 6  ;;  %s4438_s11 = scalar_lea.hbm %s5570_s0, %s3063_s18 }
  0x71   : > { %s283_s16 = scalar_lea.vmem [#allocation3], %s2974_s23  ;;  %p4442_p11 = pnand %p3622_p3, %p41_p5 }
  0x72   : > { %s290_s14 = sshll.u32 %s283_s16, 4  ;;  %s4446_s12 = scalar_lea.sflag [#allocation4], %s279_s21  ;;  %s4440_s14 = int_to_ptr.vmem [resolvable:$true] %s290_s14 }
  0x73   : > { %s4095_s17 = scalar_lea.hbm %s4438_s11, 1024  ;;  %p4097_p9 = pneg %p4442_p11 }
  0x74   : > { %p4096_p7 = scmp.ne.s32.totalorder %s4438_s11, %s4095_s17  ;;  %s4100_s29 = scalar_lea.hbm %s5570_s0, 2048 }
  0x75   : > { %p4101_p1 = scmp.lt.u32.totalorder %s4438_s11, %s5570_s0  ;;  %p4102_p2 = scmp.lt.u32.totalorder %s4100_s29, %s4095_s17 }
  0x76   : > { %p4098_p12 = pnand %p4097_p9, %p4096_p7  ;;  %p4104_p4 = scmp.lt.u32.totalorder %s4095_s17, %s4438_s11 }
  0x77   : > { %p4103_p13 = por %p4102_p2, %p4101_p1 }
  0x78   : > { %p4099_p0 = pneg %p4098_p12 }
  0x79   : > { %p4105_p8 = por %p4104_p4, %p4103_p13 }
  0x7b   : > { %p4106_p6 = pnand %p4105_p8, %p4099_p0 }
  0x7d   : > { %4109 = shalt.err (!%p4106_p6)
}
  0x7e   : > { %s4110_s21 = scalar_lea.vmem %s4440_s14, 1024  ;;  %s4207_s23 = smov [#allocation3]  }
  0x7f   : > { %p4111_p3 = scmp.ne.s32.totalorder %s4440_s14, %s4110_s21  ;;  %s4115_s18 = sshll.u32 %s4207_s23, 4  ;;  %s4116_s18 = int_to_ptr.vmem [resolvable:$false] %s4115_s18 }
  0x80   : > { %s4117_s10 = scalar_lea.vmem %s4116_s18, 2048  ;;  %p4118_p12 = scmp.lt.s32.totalorder %s4440_s14, %s4116_s18 }
  0x81   : > { %p4113_p5 = pnand %p4111_p3, %p4097_p9  ;;  %p4119_p1 = scmp.lt.s32.totalorder %s4117_s10, %s4110_s21 }
  0x83   : > { %p4114_p7 = pneg %p4113_p5  ;;  %p4120_p2 = por %p4119_p1, %p4118_p12 }
  0x85   : > { %p4121_p13 = pnand %p4120_p2, %p4114_p7 }
  0x87   : > { %4124 = shalt.err (!%p4121_p13)
}
  0x88   : > { %3613 = dma.hbm_to_vmem [thread:$0]  (!%p4442_p11), %s4438_s11, 1024, %s4440_s14, %s4446_s12, %s4204_s13, %s4204_s13, %s4205_s15  }
  0x89   : > { %p5592_p9 = scmp.ne.s32.totalorder %s5586_s9, 0 }
  0x8b   : > { %302 = sbr.rel (%p5592_p9) target bundleno = 3464 (0xd88), region = 48 }
  0x92   : > { %s4480_s17 = sand.u32 1, %s4191_s25   ;;  %p5593_p0 = scmp.ne.s32.totalorder %s5583_s30, 0 }
  0x93   : > { %s2978_s29 = sshll.u32 %s4480_s17, 6  ;;  %s305_s16 = scalar_lea.sflag [#allocation4], %s4480_s17 }
  0x94   : > { %s4484_s21 = scalar_lea.vmem [#allocation3], %s2978_s29 }
  0x95   : > { %4170 = dma.done.wait (%p5593_p0), %s305_s16, 1024  }
  0x96   : > { %4172 = vsyncadd (%p5593_p0), %s305_s16, 4294966272  ;;  %p5594_p11 = scmp.eq.s32.totalorder %s4275_s28, 0 }
  0x98   : > { %4174 = dma.done.wait (%p5594_p11), [#allocation7], 2048   ;;  %p5595_p4 = pmov %p5594_p11 }
  0x9a   : > { %4176 = vsyncadd (%p5595_p4), [#allocation7], 4294965248  ;;  %p5596_p8 = pmov %p5595_p4 }
  0x9b   : > { %p5597_p6 = pmov %p5595_p4 }
  0x9c   : > { %4178 = dma.done.wait (%p5596_p8), [#allocation10], 2048  }
  0x9d   : > { %4180 = vsyncadd (%p5597_p6), [#allocation10], 4294965248  ;;  %v3671_v0 = vld [vmem:[#allocation9] sm:$0xff]   ;;  %v3672_v1 = vld [vmem:[#allocation9 + $0x8] sm:$0xff]   ;;  %vm686_vm0 = vcmask 261120   ;;  %s4208_s30 = smov 96  }
  0x9e   : > { %3225 = vmatprep.subr.bf16.mxu0 %v3671_v0  ;;  %v3673_v2 = vld [vmem:[#allocation9 + $0x10] sm:$0xff]   ;;  %v3674_v3 = vld [vmem:[#allocation9 + $0x18] sm:$0xff]   ;;  %v3679_v4 = vld [vmem:[%s4484_s21] sm:$0xff]   ;;  %s4209_s15 = smov 64   ;;  %s4210_s11 = smov 32   ;;  %vm1643_vm1 = vcmask 523520  }
  0x9f   : > { %3226 = vmatpush3.bf16.msra.mxu0 %v3671_v0  ;;  %3241 = vmatprep.mubr.bf16.mxu0 %v3679_v4  ;;  %v3675_v5 = vld [vmem:[#allocation9 + $0x20] sm:$0xff]   ;;  %v3676_v6 = vld [vmem:[#allocation9 + $0x28] sm:$0xff]   ;;  %v3677_v10 = vld [vmem:[#allocation9 + $0x30] sm:$0xff]   ;;  %vm2142_vm2 = vcmask 785920   ;;  %vm2641_vm3 = vcmask 1048320   ;;  %s2983_s14 = sshll.u32 %s4480_s17, 7 }
  0xa0   : > { %3227 = vmatprep.subr.bf16.mxu0 %v3672_v1  ;;  %v4499_v7 = vld [vmem:[#allocation6] sm:$0xff]   ;;  %v4501_v8 = vld [vmem:[#allocation6 + $0x8] sm:$0xff]   ;;  %v4509_v11 = vld [vmem:[#allocation6 + $0x10] sm:$0xff]   ;;  %s5501_s23 = scalar_lea.vmem [#allocation12], %s2983_s14  ;;  %s3064_s18 = sshll.u32 %s4275_s28, 11 }
  0xa1   : > { %3545 = vmatprep.subr.msk.bf16.mxu1 %vm686_vm0, %v4499_v7  ;;  %v712_v9 = vsel %vm686_vm0, %v4499_v7, 0  ;;  %v3678_v12 = vld [vmem:[#allocation9 + $0x38] sm:$0xff]   ;;  %v715_v13 = vsel %vm686_vm0, %v4501_v8, 0  ;;  %v718_v14 = vsel %vm686_vm0, %v4509_v11, 0  ;;  %v3680_v15 = vld [vmem:[%s4484_s21 + $0x8] sm:$0xff]   ;;  %v3681_v16 = vld [vmem:[%s4484_s21 + $0x10] sm:$0xff]   ;;  %1171 = vrot.lane.b32.xlu1 %v4501_v8, %s4208_s30 }
  0xa2   : > { %3258 = vmatpush3.bf16.xpose.msra.mxu1 %v712_v9  ;;  %v4519_v17 = vld [vmem:[#allocation6 + $0x18] sm:$0xff]   ;;  %v3683_v19 = vld [vmem:[%s4484_s21 + $0x20] sm:$0xff]   ;;  %v3684_v22 = vld [vmem:[%s4484_s21 + $0x28] sm:$0xff]   ;;  %1169 = vrot.lane.b32.xlu0 %v4499_v7, %s4208_s30  ;;  %s2856_s10 = sshll.u32 %s5501_s23, 4  ;;  %s2843_s28 = scalar_lea.sflag [#allocation5], %s4480_s17  ;;  %s5523_s10 = int_to_ptr.vmem [resolvable:$true] %s2856_s10 }
  0xa3   : > { %3228 = vmatpush3.bf16.msra.mxu0 %v3672_v1  ;;  %3546 = vmatprep.subr.msk.bf16.mxu1 %vm686_vm0, %v4501_v8  ;;  %v3682_v18 = vld [vmem:[%s4484_s21 + $0x18] sm:$0xff]   ;;  %v721_v20 = vsel %vm686_vm0, %v4519_v17, 0  ;;  %v4527_v21 = vld [vmem:[#allocation6 + $0x20] sm:$0xff]   ;;  %v3685_v23 = vld [vmem:[%s4484_s21 + $0x30] sm:$0xff]   ;;  %s4211_s9 = smov [#allocation12]  }
  0xa4   : > { %3229 = vmatprep.subr.bf16.mxu0 %v3673_v2  ;;  %v724_v24 = vsel %vm686_vm0, %v4527_v21, 0  ;;  %v4535_v25 = vld [vmem:[#allocation6 + $0x28] sm:$0xff]   ;;  %v3686_v26 = vld [vmem:[%s4484_s21 + $0x38] sm:$0xff]   ;;  %v4542_v28 = vld [vmem:[#allocation6 + $0x30] sm:$0xff]   ;;  %s5521_s21 = scalar_lea.hbm %s5577_s7, %s3064_s18  ;;  %s4129_s13 = sshll.u32 %s4211_s9, 4  ;;  %s4130_s13 = int_to_ptr.vmem [resolvable:$false] %s4129_s13 }
  0xa5   : > { %v727_v27 = vsel %vm686_vm0, %v4535_v25, 0  ;;  %v730_v29 = vsel %vm686_vm0, %v4542_v28, 0  ;;  %v4548_v30 = vld [vmem:[#allocation6 + $0x38] sm:$0xff]   ;;  %v2984_v32 = vld [vmem:[%s5574_s4] ss:$0 sm:$0xff]  ;;  %p4132_p12 = scmp.lt.s32.totalorder %s5523_s10, %s4130_s13 }
  0xa6   : > { %v733_v31 = vsel %vm686_vm0, %v4548_v30, 0 }
  0xa7   : > { %3230 = vmatpush3.bf16.msra.mxu0 %v3673_v2 }
  0xa8   : > { %3231 = vmatprep.subr.bf16.mxu0 %v3674_v3 }
  0xaa   : > { %3260 = vmatpush3.bf16.xpose.msra.mxu1 %v715_v13 }
  0xab   : > { %3232 = vmatpush3.bf16.msra.mxu0 %v3674_v3  ;;  %3547 = vmatprep.subr.msk.bf16.mxu1 %vm686_vm0, %v4509_v11 }
  0xac   : > { %3233 = vmatprep.subr.bf16.mxu0 %v3675_v5 }
  0xaf   : > { %3234 = vmatpush3.bf16.msra.mxu0 %v3675_v5 }
  0xb0   : > { %3235 = vmatprep.subr.bf16.mxu0 %v3676_v6 }
  0xb2   : > { %3262 = vmatpush3.bf16.xpose.msra.mxu1 %v718_v14 }
  0xb3   : > { %3236 = vmatpush3.bf16.msra.mxu0 %v3676_v6  ;;  %3548 = vmatprep.subr.msk.bf16.mxu1 %vm686_vm0, %v4519_v17 }
  0xb4   : > { %3237 = vmatprep.subr.bf16.mxu0 %v3677_v10 }
  0xb7   : > { %3238 = vmatpush3.bf16.msra.mxu0 %v3677_v10 }
  0xb8   : > { %3239 = vmatprep.subr.bf16.mxu0 %v3678_v12 }
  0xba   : > { %3264 = vmatpush3.bf16.xpose.msra.mxu1 %v721_v20 }
  0xbb   : > { %3240 = vmatpush3.bf16.msra.mxu0 %v3678_v12  ;;  %3549 = vmatprep.subr.msk.bf16.mxu1 %vm686_vm0, %v4527_v21 }
  0xbe   : > { %3242 = vmatmul.mubr.bf16.vlgmr.msra.gmra.mrb[0].mxu0 %v3680_v15 }
  0xbf   : > { %3245 = vmatprep.mubr.bf16.mxu0 %v3681_v16 }
  0xc2   : > { %3266 = vmatpush3.bf16.xpose.msra.mxu1 %v724_v24 }
  0xc3   : > { %3550 = vmatprep.subr.msk.bf16.mxu1 %vm686_vm0, %v4535_v25 }
  0xc6   : > { %3246 = vmatmul.mubr.bf16.gmra.mrb[4].mxu0 %v3682_v18 }
  0xc7   : > { %3249 = vmatprep.mubr.bf16.mxu0 %v3683_v19 }
  0xca   : > { %3268 = vmatpush3.bf16.xpose.msra.mxu1 %v727_v27 }
  0xcb   : > { %3551 = vmatprep.subr.msk.bf16.mxu1 %vm686_vm0, %v4542_v28 }
  0xce   : > { %3250 = vmatmul.mubr.bf16.gmra.mrb[8].mxu0 %v3684_v22 }
  0xcf   : > { %3253 = vmatprep.mubr.bf16.mxu0 %v3685_v23 }
  0xd2   : > { %3270 = vmatpush3.bf16.xpose.msra.mxu1 %v730_v29 }
  0xd3   : > { %3552 = vmatprep.subr.msk.bf16.mxu1 %vm686_vm0, %v4548_v30 }
  0xd6   : > { %3254 = vmatmul.mubr.bf16.gmra.mrb[12].mxu0 %v3686_v26 }
  0xda   : > { %3272 = vmatpush3.bf16.xpose.msra.mxu1 %v733_v31 }
 0x191   : > { %v3243_v33 = vpop.f32.mrb[0].mxu0 }
 0x192   : > { %v536_v34 = vadd.f32 %v3243_v33, %v2984_v32  ;;  %v527_v35 = vpop.f32.mrb[1].mxu0 }
 0x193   : > { %v528_v36 = vadd.f32 %v2984_v32, %v527_v35  ;;  %v3244_v37 = vpop.f32.mrb[2].mxu0  ;;  %v4595_v35 = vld [vmem:[#allocation8 + $0x8] sm:$0xff]  }
 0x194   : > { %v539_v38 = vadd.f32 %v3244_v37, %v2984_v32  ;;  %v530_v39 = vpop.f32.mrb[3].mxu0  ;;  %v592_v41 = vmul.f32 0.17677669, %v536_v34  ;;  %v4593_v34 = vld [vmem:[#allocation8] sm:$0xff]  }
 0x195   : > { %v531_v40 = vadd.f32 %v2984_v32, %v530_v39  ;;  %v590_v43 = vmul.f32 0.17677669, %v528_v36  ;;  %3289 = vmatprep.subr.bf16.mxu0 %v4593_v34  ;;  %v4604_v36 = vld [vmem:[#allocation8 + $0x18] sm:$0xff]   ;;  %v4608_v37 = vld [vmem:[#allocation8 + $0x20] sm:$0xff]   ;;  %v4617_v39 = vld [vmem:[#allocation8 + $0x30] sm:$0xff]  }
 0x196   : > { %v593_v42 = vmul.f32 0.17677669, %v539_v38  ;;  %3290 = vmatpush3.bf16.msra.mxu0 %v4593_v34  ;;  %v4613_v38 = vld [vmem:[#allocation8 + $0x28] sm:$0xff]  }
 0x197   : > { %v591_v44 = vmul.f32 0.17677669, %v531_v40  ;;  %3291 = vmatprep.subr.bf16.mxu0 %v4595_v35  ;;  %v4619_v40 = vld [vmem:[#allocation8 + $0x38] sm:$0xff]  }
 0x198   : > { %v4561_v45 = vpack.c.bf16 %v593_v42, %v592_v41  ;;  %v4624_v41 = vpop.permute.xlu0 %1169 }
 0x199   : > { %v4563_v46 = vpack.c.bf16 %v591_v44, %v590_v43  ;;  %v3247_v47 = vpop.f32.mrb[4].mxu0 }
 0x19a   : > { %v552_v48 = vadd.f32 %v3247_v47, %v2984_v32  ;;  %v543_v49 = vpop.f32.mrb[5].mxu0  ;;  %3292 = vmatpush3.bf16.msra.mxu0 %v4595_v35 }
 0x19b   : > { %v544_v50 = vadd.f32 %v2984_v32, %v543_v49  ;;  %v3248_v51 = vpop.f32.mrb[6].mxu0  ;;  %3273 = vmatprep.mubr.msk.bf16.mxu1 %vm686_vm0, %v4563_v46 }
 0x19c   : > { %v596_v52 = vmul.f32 0.17677669, %v552_v48  ;;  %v555_v53 = vadd.f32 %v3248_v51, %v2984_v32  ;;  %v546_v54 = vpop.f32.mrb[7].mxu0  ;;  %3274 = vmatmul.mubr.msk.bf16.vlgmr.msra.gmra.mrb[0].mxu1 %vm686_vm0, %v4561_v45 }
 0x19d   : > { %v594_v55 = vmul.f32 0.17677669, %v544_v50  ;;  %v547_v56 = vadd.f32 %v2984_v32, %v546_v54 }
 0x19e   : > { %v597_v57 = vmul.f32 0.17677669, %v555_v53 }
 0x19f   : > { %v595_v58 = vmul.f32 0.17677669, %v547_v56 }
 0x1a0   : > { %v4569_v59 = vpack.c.bf16 %v597_v57, %v596_v52 }
 0x1a1   : > { %v4571_v60 = vpack.c.bf16 %v595_v58, %v594_v55  ;;  %v3251_v61 = vpop.f32.mrb[8].mxu0 }
 0x1a2   : > { %v568_v62 = vadd.f32 %v3251_v61, %v2984_v32  ;;  %v559_v63 = vpop.f32.mrb[9].mxu0 }
 0x1a3   : > { %v560_v0 = vadd.f32 %v2984_v32, %v559_v63  ;;  %v3252_v1 = vpop.f32.mrb[10].mxu0  ;;  %3277 = vmatprep.mubr.msk.bf16.mxu1 %vm686_vm0, %v4571_v60 }
 0x1a4   : > { %v600_v2 = vmul.f32 0.17677669, %v568_v62  ;;  %v571_v3 = vadd.f32 %v3252_v1, %v2984_v32  ;;  %v562_v4 = vpop.f32.mrb[11].mxu0  ;;  %3278 = vmatmul.mubr.msk.bf16.gmra.mrb[4].mxu1 %vm686_vm0, %v4569_v59  ;;  %v4663_v62 = vpop.permute.xlu1 %1171 }
 0x1a5   : > { %v598_v5 = vmul.f32 0.17677669, %v560_v0  ;;  %v563_v6 = vadd.f32 %v2984_v32, %v562_v4 }
 0x1a6   : > { %v601_v9 = vmul.f32 0.17677669, %v571_v3 }
 0x1a7   : > { %v599_v10 = vmul.f32 0.17677669, %v563_v6 }
 0x1a8   : > { %v4577_v12 = vpack.c.bf16 %v601_v9, %v600_v2 }
 0x1a9   : > { %v4579_v13 = vpack.c.bf16 %v599_v10, %v598_v5  ;;  %v3255_v14 = vpop.f32.mrb[12].mxu0 }
 0x1aa   : > { %v584_v15 = vadd.f32 %v3255_v14, %v2984_v32  ;;  %v575_v16 = vpop.f32.mrb[13].mxu0 }
 0x1ab   : > { %v576_v18 = vadd.f32 %v2984_v32, %v575_v16  ;;  %3281 = vmatprep.mubr.msk.bf16.mxu1 %vm686_vm0, %v4579_v13  ;;  %v3256_v19 = vpop.f32.mrb[14].mxu0 }
 0x1ac   : > { %v604_v20 = vmul.f32 0.17677669, %v584_v15  ;;  %v587_v22 = vadd.f32 %v3256_v19, %v2984_v32  ;;  %3282 = vmatmul.mubr.msk.bf16.gmra.mrb[8].mxu1 %vm686_vm0, %v4577_v12  ;;  %v578_v23 = vpop.f32.mrb[15].mxu0 }
 0x1ad   : > { %v602_v24 = vmul.f32 0.17677669, %v576_v18  ;;  %v579_v26 = vadd.f32 %v2984_v32, %v578_v23  ;;  %v4600_v32 = vld [vmem:[#allocation8 + $0x10] sm:$0xff]  }
 0x1ae   : > { %v605_v27 = vmul.f32 0.17677669, %v587_v22  ;;  %3293 = vmatprep.subr.bf16.mxu0 %v4600_v32 }
 0x1af   : > { %v603_v29 = vmul.f32 0.17677669, %v579_v26  ;;  %3294 = vmatpush3.bf16.msra.mxu0 %v4600_v32 }
 0x1b0   : > { %v4585_v31 = vpack.c.bf16 %v605_v27, %v604_v20  ;;  %3295 = vmatprep.subr.bf16.mxu0 %v4604_v36 }
 0x1b1   : > { %v4587_v33 = vpack.c.bf16 %v603_v29, %v602_v24 }
 0x1b3   : > { %3285 = vmatprep.mubr.msk.bf16.mxu1 %vm686_vm0, %v4587_v33  ;;  %3296 = vmatpush3.bf16.msra.mxu0 %v4604_v36 }
 0x1b4   : > { %3286 = vmatmul.mubr.msk.bf16.gmra.mrb[12].mxu1 %vm686_vm0, %v4585_v31  ;;  %3297 = vmatprep.subr.bf16.mxu0 %v4608_v37 }
 0x1b7   : > { %3298 = vmatpush3.bf16.msra.mxu0 %v4608_v37 }
 0x1b8   : > { %3299 = vmatprep.subr.bf16.mxu0 %v4613_v38 }
 0x1bb   : > { %3300 = vmatpush3.bf16.msra.mxu0 %v4613_v38 }
 0x1bc   : > { %3301 = vmatprep.subr.bf16.mxu0 %v4617_v39 }
 0x1bf   : > { %3302 = vmatpush3.bf16.msra.mxu0 %v4617_v39 }
 0x1c0   : > { %3303 = vmatprep.subr.bf16.mxu0 %v4619_v40 }
 0x1c3   : > { %3304 = vmatpush3.bf16.msra.mxu0 %v4619_v40 }
 0x1c4   : > { %3553 = vmatprep.subr.msk.bf16.mxu0 %vm686_vm0, %v4624_v41 }
 0x26f   : > { %v3275_v42 = vpop.f32.mrb[0].mxu1 }
 0x270   : > { %836 = vmax.xlane.f32.xlu1 %v3275_v42  ;;  %v769_v43 = vpop.f32.mrb[1].mxu1 }
 0x271   : > { %832 = vmax.xlane.f32.xlu0 %v769_v43  ;;  %v3276_v44 = vpop.f32.mrb[2].mxu1 }
 0x272   : > { %v772_v47 = vpop.f32.mrb[3].mxu1 }
 0x274   : > { %838 = vmax.xlane.f32.xlu1 %v3276_v44 }
 0x275   : > { %834 = vmax.xlane.f32.xlu0 %v772_v47 }
 0x277   : > { %v3279_v48 = vpop.f32.mrb[4].mxu1 }
 0x278   : > { %v4629_v49 = vpop.f32.mrb[5].mxu1 }
 0x279   : > { %844 = vmax.xlane.f32.xlu0 %v3279_v48  ;;  %v4631_v50 = vpop.f32.mrb[6].mxu1 }
 0x27a   : > { %846 = vmax.xlane.f32.xlu1 %v4631_v50  ;;  %v4634_v51 = vpop.f32.mrb[7].mxu1 }
 0x27d   : > { %840 = vmax.xlane.f32.xlu0 %v4629_v49 }
 0x27e   : > { %842 = vmax.xlane.f32.xlu1 %v4634_v51 }
 0x27f   : > { %v4638_v52 = vpop.f32.mrb[8].mxu1 }
 0x280   : > { %v4640_v53 = vpop.f32.mrb[9].mxu1 }
 0x281   : > { %852 = vmax.xlane.f32.xlu0 %v4638_v52  ;;  %v4643_v54 = vpop.f32.mrb[10].mxu1 }
 0x282   : > { %854 = vmax.xlane.f32.xlu1 %v4643_v54  ;;  %v4646_v55 = vpop.f32.mrb[11].mxu1 }
 0x285   : > { %848 = vmax.xlane.f32.xlu0 %v4640_v53 }
 0x286   : > { %850 = vmax.xlane.f32.xlu1 %v4646_v55 }
 0x287   : > { %v3287_v56 = vpop.f32.mrb[12].mxu1 }
 0x288   : > { %v4650_v57 = vpop.f32.mrb[13].mxu1 }
 0x289   : > { %860 = vmax.xlane.f32.xlu0 %v3287_v56  ;;  %v4652_v58 = vpop.f32.mrb[14].mxu1 }
 0x28a   : > { %v4654_v61 = vpop.f32.mrb[15].mxu1 }
 0x28d   : > { %856 = vmax.xlane.f32.xlu0 %v4650_v57 }
 0x297   : > { %1175 = vrot.lane.b32.xlu1 %v4519_v17, %s4208_s30 }
 0x2a3   : > { %1173 = vrot.lane.b32.xlu0 %v4509_v11, %s4208_s30 }
 0x2bb   : > { %862 = vmax.xlane.f32.xlu1 %v4652_v58 }
 0x2bf   : > { %858 = vmax.xlane.f32.xlu1 %v4654_v61 }
 0x2fd   : > { %v837_v63 = vpop.xlane.xlu1 %836 }
 0x2fe   : > { %v866_v0 = vsub.f32 %v3275_v42, %v837_v63  ;;  %v833_v1 = vpop.xlane.xlu0 %832 }
 0x2ff   : > { %v864_v2 = vsub.f32 %v769_v43, %v833_v1 }
 0x300   : > { %v884_v3 = vmul.f32 1.442695, %v866_v0 }
 0x301   : > { %v880_v4 = vmul.f32 1.442695, %v864_v2  ;;  %v839_v5 = vpop.xlane.xlu1 %838 }
 0x302   : > { %3711 = vpow2.f32 %v884_v3  ;;  %v867_v6 = vsub.f32 %v3276_v44, %v839_v5  ;;  %v835_v9 = vpop.xlane.xlu0 %834 }
 0x303   : > { %v865_v10 = vsub.f32 %v772_v47, %v835_v9  ;;  %3713 = vpow2.f32 %v880_v4 }
 0x304   : > { %v886_v14 = vmul.f32 1.442695, %v867_v6 }
 0x305   : > { %v882_v11 = vmul.f32 1.442695, %v865_v10 }
 0x306   : > { %3715 = vpow2.f32 %v886_v14  ;;  %v845_v20 = vpop.xlane.xlu0 %844 }
 0x307   : > { %3717 = vpow2.f32 %v882_v11  ;;  %v847_v24 = vpop.xlane.xlu1 %846  ;;  %v870_v29 = vsub.f32 %v3279_v48, %v845_v20 }
 0x308   : > { %v871_v0 = vsub.f32 %v4631_v50, %v847_v24 }
 0x309   : > { %v892_v44 = vmul.f32 1.442695, %v870_v29 }
 0x30a   : > { %v841_v22 = vpop.xlane.xlu0 %840 }
 0x30b   : > { %v843_v27 = vpop.xlane.xlu1 %842  ;;  %v868_v42 = vsub.f32 %v4629_v49, %v841_v22  ;;  %3719 = vpow2.f32 %v892_v44 }
 0x30c   : > { %v4665_v15 = vpop.eup %3711  ;;  %v869_v47 = vsub.f32 %v4634_v51, %v843_v27 }
 0x30d   : > { %916 = vadd.xlane.f32.xlu0 %v4665_v15  ;;  %v4668_v16 = vpop.eup %3713  ;;  %v888_v1 = vmul.f32 1.442695, %v868_v42 }
 0x30e   : > { %v853_v23 = vpop.xlane.xlu0 %852  ;;  %v890_v2 = vmul.f32 1.442695, %v869_v47 }
 0x30f   : > { %v855_v63 = vpop.xlane.xlu1 %854  ;;  %3721 = vpow2.f32 %v888_v1  ;;  %v874_v5 = vsub.f32 %v4638_v52, %v853_v23 }
 0x310   : > { %v4670_v18 = vpop.eup %3715  ;;  %3723 = vpow2.f32 %v890_v2  ;;  %v875_v52 = vsub.f32 %v4643_v54, %v855_v63 }
 0x311   : > { %912 = vadd.xlane.f32.xlu0 %v4668_v16  ;;  %918 = vadd.xlane.f32.xlu1 %v4670_v18  ;;  %v4674_v19 = vpop.eup %3717  ;;  %v900_v9 = vmul.f32 1.442695, %v874_v5 }
 0x312   : > { %v849_v26 = vpop.xlane.xlu0 %848  ;;  %v902_v22 = vmul.f32 1.442695, %v875_v52 }
 0x313   : > { %v851_v6 = vpop.xlane.xlu1 %850  ;;  %v872_v51 = vsub.f32 %v4640_v53, %v849_v26 }
 0x314   : > { %v873_v23 = vsub.f32 %v4646_v55, %v851_v6 }
 0x315   : > { %914 = vadd.xlane.f32.xlu1 %v4674_v19  ;;  %v4689_v14 = vpop.eup %3719 }
 0x316   : > { %v861_v43 = vpop.xlane.xlu0 %860 }
 0x317   : > { %v878_v3 = vsub.f32 %v3287_v56, %v861_v43  ;;  %v4687_v10 = vpop.permute.xlu1 %1175  ;;  %v896_v56 = vmul.f32 1.442695, %v872_v51 }
 0x319   : > { %v908_v48 = vmul.f32 1.442695, %v878_v3  ;;  %v4693_v11 = vpop.eup %3721 }
 0x31a   : > { %v857_v4 = vpop.xlane.xlu0 %856  ;;  %v4695_v20 = vpop.eup %3723 }
 0x31b   : > { %v876_v49 = vsub.f32 %v4650_v57, %v857_v4 }
 0x31d   : > { %v904_v50 = vmul.f32 1.442695, %v876_v49 }
 0x326   : > { %1179 = vrot.lane.b32.xlu1 %v4535_v25, %s4208_s30 }
 0x327   : > { %1177 = vrot.lane.b32.xlu0 %v4527_v21, %s4208_s30  ;;  %v894_v21 = vmul.f32 1.442695, %v871_v0 }
 0x329   : > { %3725 = vpow2.f32 %v894_v21 }
 0x32a   : > { %3727 = vpow2.f32 %v908_v48 }
 0x32b   : > { %3729 = vpow2.f32 %v900_v9 }
 0x32c   : > { %3731 = vpow2.f32 %v904_v50 }
 0x32d   : > { %3733 = vpow2.f32 %v896_v56  ;;  %v1210_v56 = vsel %vm686_vm0, %v4624_v41, 0 }
 0x333   : > { %v4701_v26 = vpop.eup %3725 }
 0x334   : > { %v4703_v27 = vpop.eup %3727 }
 0x335   : > { %v4708_v42 = vpop.eup %3729 }
 0x336   : > { %v4710_v43 = vpop.eup %3731 }
 0x337   : > { %v4714_v44 = vpop.eup %3733 }
 0x346   : > { %924 = vadd.xlane.f32.xlu0 %v4689_v14 }
 0x348   : > { %v863_v57 = vpop.xlane.xlu1 %862 }
 0x349   : > { %v879_v53 = vsub.f32 %v4652_v58, %v863_v57  ;;  %v898_v58 = vmul.f32 1.442695, %v873_v23 }
 0x34a   : > { %922 = vadd.xlane.f32.xlu0 %v4695_v20  ;;  %920 = vadd.xlane.f32.xlu1 %v4693_v11 }
 0x34b   : > { %v910_v24 = vmul.f32 1.442695, %v879_v53 }
 0x34c   : > { %v859_v54 = vpop.xlane.xlu1 %858 }
 0x34d   : > { %3735 = vpow2.f32 %v910_v24  ;;  %v877_v29 = vsub.f32 %v4654_v61, %v859_v54 }
 0x34e   : > { %940 = vadd.xlane.f32.xlu0 %v4703_v27  ;;  %926 = vadd.xlane.f32.xlu1 %v4701_v26  ;;  %3737 = vpow2.f32 %v902_v22 }
 0x34f   : > { %3739 = vpow2.f32 %v898_v58  ;;  %v906_v55 = vmul.f32 1.442695, %v877_v29 }
 0x351   : > { %3741 = vpow2.f32 %v906_v55 }
 0x352   : > { %936 = vadd.xlane.f32.xlu0 %v4710_v43  ;;  %932 = vadd.xlane.f32.xlu1 %v4708_v42 }
 0x356   : > { %928 = vadd.xlane.f32.xlu1 %v4714_v44 }
 0x357   : > { %v4717_v47 = vpop.eup %3735 }
 0x358   : > { %942 = vadd.xlane.f32.xlu0 %v4717_v47  ;;  %v4720_v61 = vpop.eup %3737 }
 0x359   : > { %v4723_v63 = vpop.eup %3739 }
 0x35a   : > { %934 = vadd.xlane.f32.xlu1 %v4720_v61 }
 0x35b   : > { %v4726_v0 = vpop.eup %3741 }
 0x35e   : > { %930 = vadd.xlane.f32.xlu1 %v4723_v63 }
 0x362   : > { %938 = vadd.xlane.f32.xlu1 %v4726_v0 }
 0x36e   : > { %1181 = vrot.lane.b32.xlu0 %v4542_v28, %s4208_s30  ;;  %v1174_v28 = vpop.permute.xlu0 %1173 }
 0x372   : > { %1153 = vrot.lane.b32.xlu0 %v4563_v46, %s4208_s30 }
 0x373   : > { %1183 = vrot.lane.b32.xlu1 %v4548_v30, %s4208_s30 }
 0x376   : > { %1157 = vrot.lane.b32.xlu0 %v4571_v60, %s4208_s30 }
 0x377   : > { %1155 = vrot.lane.b32.xlu1 %v4561_v45, %s4208_s30 }
 0x37a   : > { %1161 = vrot.lane.b32.xlu0 %v4579_v13, %s4208_s30 }
 0x37b   : > { %1159 = vrot.lane.b32.xlu1 %v4569_v59, %s4208_s30 }
 0x37e   : > { %1165 = vrot.lane.b32.xlu0 %v4587_v33, %s4208_s30 }
 0x37f   : > { %1163 = vrot.lane.b32.xlu1 %v4577_v12, %s4208_s30 }
 0x382   : > { %1482 = vrot.lane.b32.xlu0 %v4593_v34, %s4208_s30 }
 0x383   : > { %1167 = vrot.lane.b32.xlu1 %v4585_v31, %s4208_s30 }
 0x386   : > { %1486 = vrot.lane.b32.xlu0 %v4600_v32, %s4208_s30 }
 0x387   : > { %1484 = vrot.lane.b32.xlu1 %v4595_v35, %s4208_s30 }
 0x38a   : > { %1490 = vrot.lane.b32.xlu0 %v4608_v37, %s4208_s30 }
 0x38b   : > { %1488 = vrot.lane.b32.xlu1 %v4604_v36, %s4208_s30 }
 0x38e   : > { %1494 = vrot.lane.b32.xlu0 %v4617_v39, %s4208_s30 }
 0x38f   : > { %1492 = vrot.lane.b32.xlu1 %v4613_v38, %s4208_s30 }
 0x392   : > { %1668 = vrot.lane.b32.xlu0 %v4499_v7, %s4209_s15 }
 0x393   : > { %1496 = vrot.lane.b32.xlu1 %v4619_v40, %s4208_s30 }
 0x397   : > { %1670 = vrot.lane.b32.xlu1 %v4501_v8, %s4209_s15 }
 0x39a   : > { %v917_v30 = vpop.xlane.xlu0 %916 }
 0x39e   : > { %v913_v1 = vpop.xlane.xlu0 %912  ;;  %v919_v2 = vpop.xlane.xlu1 %918 }
 0x39f   : > { %3743 = vrcp.f32 %v919_v2 }
 0x3a0   : > { %3745 = vrcp.f32 %v913_v1 }
 0x3a1   : > { %3747 = vrcp.f32 %v917_v30 }
 0x3a2   : > { %v915_v3 = vpop.xlane.xlu1 %914  ;;  %v1178_v41 = vpop.permute.xlu0 %1177 }
 0x3a3   : > { %3749 = vrcp.f32 %v915_v3 }
 0x3a9   : > { %v3744_v4 = vpop.eup %3743 }
 0x3aa   : > { %v3746_v21 = vpop.eup %3745  ;;  %v963_v48 = vmul.f32 %v3744_v4, %v4670_v18  ;;  %v1213_v18 = vsel %vm686_vm0, %v4663_v62, 0 }
 0x3ab   : > { %v3748_v5 = vpop.eup %3747  ;;  %v960_v49 = vmul.f32 %v3746_v21, %v4668_v16  ;;  %v1216_v16 = vsel %vm686_vm0, %v1174_v28, 0 }
 0x3ac   : > { %v962_v51 = vmul.f32 %v3748_v5, %v4665_v15  ;;  %v1219_v15 = vsel %vm686_vm0, %v4687_v10, 0 }
 0x3ad   : > { %v3750_v6 = vpop.eup %3749 }
 0x3ae   : > { %v961_v9 = vmul.f32 %v3750_v6, %v4674_v19  ;;  %v977_v52 = vpack.c.bf16 %v963_v48, %v962_v51  ;;  %v1180_v19 = vpop.permute.xlu1 %1179 }
 0x3af   : > { %v1225_v24 = vsel %vm686_vm0, %v1180_v19, 0 }
 0x3b0   : > { %v976_v50 = vpack.c.bf16 %v961_v9, %v960_v49 }
 0x3b2   : > { %3305 = vmatprep.mubr.bf16.mxu0 %v976_v50 }
 0x3b3   : > { %3306 = vmatmul.mubr.bf16.vlgmr.msra.gmra.mrb[16].mxu0 %v977_v52 }
 0x3b4   : > { %3322 = vmatpush3.bf16.xpose.msra.mxu0 %v1210_v56 }
 0x3b5   : > { %3554 = vmatprep.subr.msk.bf16.mxu0 %vm686_vm0, %v4663_v62  ;;  %v1222_v62 = vsel %vm686_vm0, %v1178_v41, 0 }
 0x3bc   : > { %3324 = vmatpush3.bf16.xpose.msra.mxu0 %v1213_v18 }
 0x3bd   : > { %3555 = vmatprep.subr.msk.bf16.mxu0 %vm686_vm0, %v1174_v28 }
 0x3c4   : > { %3326 = vmatpush3.bf16.xpose.msra.mxu0 %v1216_v16 }
 0x3c5   : > { %3556 = vmatprep.subr.msk.bf16.mxu0 %vm686_vm0, %v4687_v10 }
 0x3cc   : > { %3328 = vmatpush3.bf16.xpose.msra.mxu0 %v1219_v15 }
 0x3cd   : > { %3557 = vmatprep.subr.msk.bf16.mxu0 %vm686_vm0, %v1178_v41 }
 0x3d3   : > { %v925_v57 = vpop.xlane.xlu0 %924 }
 0x3d4   : > { %3330 = vmatpush3.bf16.xpose.msra.mxu0 %v1222_v62 }
 0x3d5   : > { %3558 = vmatprep.subr.msk.bf16.mxu0 %vm686_vm0, %v1180_v19 }
 0x3d7   : > { %v923_v53 = vpop.xlane.xlu0 %922  ;;  %v921_v22 = vpop.xlane.xlu1 %920 }
 0x3d8   : > { %3751 = vrcp.f32 %v923_v53 }
 0x3d9   : > { %3753 = vrcp.f32 %v921_v22 }
 0x3da   : > { %3755 = vrcp.f32 %v925_v57 }
 0x3db   : > { %v941_v23 = vpop.xlane.xlu0 %940  ;;  %v927_v10 = vpop.xlane.xlu1 %926 }
 0x3dc   : > { %3332 = vmatpush3.bf16.xpose.msra.mxu0 %v1225_v24  ;;  %3757 = vrcp.f32 %v927_v10 }
 0x3df   : > { %v933_v54 = vpop.xlane.xlu1 %932  ;;  %v937_v58 = vpop.xlane.xlu0 %936 }
 0x3e2   : > { %v3752_v29 = vpop.eup %3751 }
 0x3e3   : > { %v3754_v55 = vpop.eup %3753  ;;  %v929_v28 = vpop.xlane.xlu1 %928  ;;  %v965_v30 = vmul.f32 %v3752_v29, %v4695_v20 }
 0x3e4   : > { %v964_v1 = vmul.f32 %v3754_v55, %v4693_v11  ;;  %v3756_v2 = vpop.eup %3755 }
 0x3e5   : > { %v943_v3 = vpop.xlane.xlu0 %942  ;;  %v966_v6 = vmul.f32 %v3756_v2, %v4689_v14 }
 0x3e6   : > { %v978_v4 = vpack.c.bf16 %v965_v30, %v964_v1  ;;  %v3758_v21 = vpop.eup %3757 }
 0x3e7   : > { %v935_v5 = vpop.xlane.xlu1 %934  ;;  %v967_v48 = vmul.f32 %v3758_v21, %v4701_v26 }
 0x3e8   : > { %3309 = vmatprep.mubr.bf16.mxu0 %v978_v4  ;;  %3759 = vrcp.f32 %v935_v5 }
 0x3e9   : > { %v1182_v49 = vpop.permute.xlu0 %1181  ;;  %3761 = vrcp.f32 %v929_v28  ;;  %v979_v9 = vpack.c.bf16 %v967_v48, %v966_v6 }
 0x3ea   : > { %3559 = vmatprep.subr.msk.bf16.mxu0 %vm686_vm0, %v1182_v49  ;;  %v1228_v20 = vsel %vm686_vm0, %v1182_v49, 0  ;;  %3763 = vrcp.f32 %v933_v54 }
 0x3eb   : > { %v931_v11 = vpop.xlane.xlu1 %930  ;;  %3334 = vmatpush3.bf16.xpose.msra.mxu0 %v1228_v20 }
 0x3ec   : > { %3310 = vmatmul.mubr.bf16.gmra.mrb[20].mxu0 %v979_v9  ;;  %3765 = vrcp.f32 %v931_v11 }
 0x3ed   : > { %3767 = vrcp.f32 %v937_v58  ;;  %v1154_v29 = vpop.permute.xlu0 %1153 }
 0x3ef   : > { %v939_v51 = vpop.xlane.xlu1 %938 }
 0x3f0   : > { %3769 = vrcp.f32 %v939_v51 }
 0x3f1   : > { %3771 = vrcp.f32 %v943_v3  ;;  %v1158_v55 = vpop.permute.xlu0 %1157 }
 0x3f2   : > { %v3760_v14 = vpop.eup %3759  ;;  %3773 = vrcp.f32 %v941_v23 }
 0x3f3   : > { %v1184_v26 = vpop.permute.xlu1 %1183  ;;  %v3762_v50 = vpop.eup %3761  ;;  %v971_v16 = vmul.f32 %v3760_v14, %v4720_v61 }
 0x3f4   : > { %3560 = vmatprep.subr.msk.bf16.mxu0 %vm686_vm0, %v1184_v26  ;;  %v1231_v52 = vsel %vm686_vm0, %v1184_v26, 0  ;;  %v3764_v56 = vpop.eup %3763  ;;  %v968_v15 = vmul.f32 %v3762_v50, %v4714_v44 }
 0x3f5   : > { %3336 = vmatpush3.bf16.xpose.msra.mxu0 %v1231_v52  ;;  %v970_v57 = vmul.f32 %v3764_v56, %v4708_v42 }
 0x3f6   : > { %v3766_v18 = vpop.eup %3765 }
 0x3f7   : > { %v969_v41 = vmul.f32 %v3766_v18, %v4723_v63  ;;  %v3768_v19 = vpop.eup %3767  ;;  %v981_v22 = vpack.c.bf16 %v971_v16, %v970_v57  ;;  %v1156_v42 = vpop.permute.xlu1 %1155 }
 0x3f8   : > { %v972_v24 = vmul.f32 %v3768_v19, %v4710_v43 }
 0x3f9   : > { %v980_v62 = vpack.c.bf16 %v969_v41, %v968_v15 }
 0x3fa   : > { %v3770_v53 = vpop.eup %3769 }
 0x3fb   : > { %v3772_v23 = vpop.eup %3771  ;;  %3313 = vmatprep.mubr.bf16.mxu0 %v980_v62  ;;  %v973_v10 = vmul.f32 %v3770_v53, %v4726_v0  ;;  %v1160_v43 = vpop.permute.xlu1 %1159 }
 0x3fc   : > { %3314 = vmatmul.mubr.bf16.gmra.mrb[24].mxu0 %v981_v22  ;;  %v3774_v54 = vpop.eup %3773  ;;  %v975_v61 = vmul.f32 %v3772_v23, %v4717_v47  ;;  %v1162_v0 = vpop.permute.xlu0 %1161 }
 0x3fd   : > { %v982_v58 = vpack.c.bf16 %v973_v10, %v972_v24  ;;  %v974_v44 = vmul.f32 %v3774_v54, %v4703_v27 }
 0x3ff   : > { %3317 = vmatprep.mubr.bf16.mxu0 %v982_v58  ;;  %v983_v63 = vpack.c.bf16 %v975_v61, %v974_v44  ;;  %v1164_v47 = vpop.permute.xlu1 %1163 }
 0x400   : > { %v1166_v28 = vpop.permute.xlu0 %1165 }
 0x403   : > { %v1168_v27 = vpop.permute.xlu1 %1167 }
 0x404   : > { %3318 = vmatmul.mubr.bf16.gmra.mrb[28].mxu0 %v983_v63  ;;  %v1483_v2 = vpop.permute.xlu0 %1482 }
 0x405   : > { %3337 = vmatprep.mubr.msk.bf16.mxu0 %vm686_vm0, %v1154_v29  ;;  %3353 = vmatprep.subr.bf16.mxu1 %v1483_v2 }
 0x406   : > { %3354 = vmatpush3.bf16.msra.mxu1 %v1483_v2 }
 0x407   : > { %v1485_v4 = vpop.permute.xlu1 %1484 }
 0x408   : > { %3355 = vmatprep.subr.bf16.mxu1 %v1485_v4  ;;  %v1487_v48 = vpop.permute.xlu0 %1486 }
 0x40a   : > { %3356 = vmatpush3.bf16.msra.mxu1 %v1485_v4 }
 0x40b   : > { %3357 = vmatprep.subr.bf16.mxu1 %v1487_v48  ;;  %v1489_v8 = vpop.permute.xlu1 %1488 }
 0x40c   : > { %3338 = vmatmul.mubr.msk.bf16.vlgmr.msra.gmra.mrb[32].mxu0 %vm686_vm0, %v1156_v42  ;;  %v1491_v7 = vpop.permute.xlu0 %1490 }
 0x40d   : > { %3341 = vmatprep.mubr.msk.bf16.mxu0 %vm686_vm0, %v1158_v55 }
 0x40e   : > { %3358 = vmatpush3.bf16.msra.mxu1 %v1487_v48 }
 0x40f   : > { %3359 = vmatprep.subr.bf16.mxu1 %v1489_v8  ;;  %v1493_v49 = vpop.permute.xlu1 %1492 }
 0x410   : > { %v1495_v9 = vpop.permute.xlu0 %1494 }
 0x412   : > { %3360 = vmatpush3.bf16.msra.mxu1 %v1489_v8 }
 0x413   : > { %3361 = vmatprep.subr.bf16.mxu1 %v1491_v7  ;;  %v1497_v20 = vpop.permute.xlu1 %1496 }
 0x414   : > { %3342 = vmatmul.mubr.msk.bf16.gmra.mrb[36].mxu0 %vm686_vm0, %v1160_v43  ;;  %v4815_v11 = vpop.permute.xlu0 %1668 }
 0x415   : > { %3345 = vmatprep.mubr.msk.bf16.mxu0 %vm686_vm0, %v1162_v0 }
 0x416   : > { %3362 = vmatpush3.bf16.msra.mxu1 %v1491_v7 }
 0x417   : > { %3363 = vmatprep.subr.bf16.mxu1 %v1493_v49  ;;  %v4867_v4 = vpop.permute.xlu1 %1670 }
 0x41a   : > { %3364 = vmatpush3.bf16.msra.mxu1 %v1493_v49 }
 0x41b   : > { %3365 = vmatprep.subr.bf16.mxu1 %v1495_v9 }
 0x41c   : > { %3346 = vmatmul.mubr.msk.bf16.gmra.mrb[40].mxu0 %vm686_vm0, %v1164_v47 }
 0x41d   : > { %3349 = vmatprep.mubr.msk.bf16.mxu0 %vm686_vm0, %v1166_v28 }
 0x41e   : > { %3366 = vmatpush3.bf16.msra.mxu1 %v1495_v9 }
 0x41f   : > { %3367 = vmatprep.subr.bf16.mxu1 %v1497_v20 }
 0x422   : > { %3368 = vmatpush3.bf16.msra.mxu1 %v1497_v20 }
 0x423   : > { %3561 = vmatprep.subr.msk.bf16.mxu1 %vm686_vm0, %v4815_v11 }
 0x424   : > { %3350 = vmatmul.mubr.msk.bf16.gmra.mrb[44].mxu0 %vm686_vm0, %v1168_v27 }
 0x486   : > { %v3307_v30 = vpop.f32.mrb[16].mxu0 }
 0x487   : > { %v1066_v1 = vpop.f32.mrb[17].mxu0 }
 0x488   : > { %v3308_v3 = vpop.f32.mrb[18].mxu0 }
 0x489   : > { %v1130_v21 = vpack.c.bf16 %v3308_v3, %v3307_v30  ;;  %v1069_v5 = vpop.f32.mrb[19].mxu0  ;;  %v4861_v3 = vld [vmem:[#allocation6 + $0x10] sm:$0xff]  }
 0x48a   : > { %v1129_v6 = vpack.c.bf16 %v1069_v5, %v1066_v1 }
 0x48b   : > { %1138 = vst.msk [vmem:[#allocation2 + $0x8] sm:$0xff] %vm686_vm0, %v1130_v21 }
 0x48c   : > { %1137 = vst.msk [vmem:[#allocation2] sm:$0xff] %vm686_vm0, %v1129_v6 }
 0x4bf   : > { %v3311_v51 = vpop.f32.mrb[20].mxu0 }
 0x4c0   : > { %v1082_v14 = vpop.f32.mrb[21].mxu0 }
 0x4c1   : > { %v3312_v26 = vpop.f32.mrb[22].mxu0 }
 0x4c2   : > { %v1132_v50 = vpack.c.bf16 %v3312_v26, %v3311_v51  ;;  %v1085_v52 = vpop.f32.mrb[23].mxu0 }
 0x4c3   : > { %v1131_v56 = vpack.c.bf16 %v1085_v52, %v1082_v14 }
 0x4c4   : > { %1140 = vst.msk [vmem:[#allocation2 + $0x18] sm:$0xff] %vm686_vm0, %v1132_v50 }
 0x4c5   : > { %1139 = vst.msk [vmem:[#allocation2 + $0x10] sm:$0xff] %vm686_vm0, %v1131_v56 }
 0x4cf   : > { %v3315_v18 = vpop.f32.mrb[24].mxu0 }
 0x4d0   : > { %v1098_v16 = vpop.f32.mrb[25].mxu0 }
 0x4d1   : > { %v3316_v15 = vpop.f32.mrb[26].mxu0 }
 0x4d2   : > { %v1134_v41 = vpack.c.bf16 %v3316_v15, %v3315_v18  ;;  %v1101_v19 = vpop.f32.mrb[27].mxu0 }
 0x4d3   : > { %v1133_v57 = vpack.c.bf16 %v1101_v19, %v1098_v16  ;;  %v4883_v16 = vld [vmem:[#allocation6 + $0x20] sm:$0xff]  }
 0x4d4   : > { %1142 = vst.msk [vmem:[#allocation2 + $0x28] sm:$0xff] %vm686_vm0, %v1134_v41 }
 0x4d5   : > { %1141 = vst.msk [vmem:[#allocation2 + $0x20] sm:$0xff] %vm686_vm0, %v1133_v57 }
 0x4d7   : > { %v3319_v62 = vpop.f32.mrb[28].mxu0 }
 0x4d8   : > { %v1114_v53 = vpop.f32.mrb[29].mxu0 }
 0x4d9   : > { %v3320_v22 = vpop.f32.mrb[30].mxu0 }
 0x4da   : > { %v1136_v23 = vpack.c.bf16 %v3320_v22, %v3319_v62  ;;  %v1117_v24 = vpop.f32.mrb[31].mxu0 }
 0x4db   : > { %v1135_v10 = vpack.c.bf16 %v1117_v24, %v1114_v53 }
 0x4dc   : > { %1144 = vst.msk [vmem:[#allocation2 + $0x38] sm:$0xff] %vm686_vm0, %v1136_v23 }
 0x4dd   : > { %1143 = vst.msk [vmem:[#allocation2 + $0x30] sm:$0xff] %vm686_vm0, %v1135_v10 }
 0x4df   : > { %v3339_v54 = vpop.f32.mrb[32].mxu0 }
 0x4e0   : > { %1334 = vmax.xlane.f32.xlu0 %v3339_v54  ;;  %v1267_v58 = vpop.f32.mrb[33].mxu0 }
 0x4e1   : > { %v3340_v61 = vpop.f32.mrb[34].mxu0 }
 0x4e2   : > { %v1270_v44 = vpop.f32.mrb[35].mxu0 }
 0x4e3   : > { %1332 = vmax.xlane.f32.xlu1 %v1270_v44 }
 0x4e4   : > { %1330 = vmax.xlane.f32.xlu0 %v1267_v58 }
 0x4e7   : > { %v4825_v63 = vpop.f32.mrb[36].mxu0 }
 0x4e8   : > { %1336 = vmax.xlane.f32.xlu0 %v3340_v61  ;;  %v4827_v29 = vpop.f32.mrb[37].mxu0 }
 0x4e9   : > { %v4829_v42 = vpop.f32.mrb[38].mxu0 }
 0x4ea   : > { %1344 = vmax.xlane.f32.xlu1 %v4829_v42  ;;  %v4832_v55 = vpop.f32.mrb[39].mxu0 }
 0x4ec   : > { %1342 = vmax.xlane.f32.xlu0 %v4825_v63 }
 0x4ee   : > { %1340 = vmax.xlane.f32.xlu1 %v4832_v55 }
 0x4ef   : > { %v4836_v43 = vpop.f32.mrb[40].mxu0 }
 0x4f0   : > { %1338 = vmax.xlane.f32.xlu0 %v4827_v29  ;;  %v4839_v0 = vpop.f32.mrb[41].mxu0 }
 0x4f1   : > { %v4841_v47 = vpop.f32.mrb[42].mxu0 }
 0x4f2   : > { %1352 = vmax.xlane.f32.xlu1 %v4841_v47  ;;  %v4844_v28 = vpop.f32.mrb[43].mxu0 }
 0x4f4   : > { %1350 = vmax.xlane.f32.xlu0 %v4836_v43 }
 0x4f6   : > { %1348 = vmax.xlane.f32.xlu1 %v4844_v28 }
 0x4f7   : > { %v4848_v27 = vpop.f32.mrb[44].mxu0 }
 0x4f8   : > { %1346 = vmax.xlane.f32.xlu0 %v4839_v0  ;;  %v4851_v30 = vpop.f32.mrb[45].mxu0 }
 0x4f9   : > { %v4853_v1 = vpop.f32.mrb[46].mxu0 }
 0x4fa   : > { %v4855_v2 = vpop.f32.mrb[47].mxu0 }
 0x4fc   : > { %1358 = vmax.xlane.f32.xlu0 %v4848_v27 }
 0x500   : > { %1354 = vmax.xlane.f32.xlu0 %v4851_v30 }
 0x507   : > { %1674 = vrot.lane.b32.xlu1 %v4519_v17, %s4209_s15 }
 0x516   : > { %1672 = vrot.lane.b32.xlu0 %v4861_v3, %s4209_s15 }
 0x52b   : > { %1360 = vmax.xlane.f32.xlu1 %v4853_v1 }
 0x52f   : > { %1356 = vmax.xlane.f32.xlu1 %v4855_v2 }
 0x56d   : > { %v1335_v21 = vpop.xlane.xlu0 %1334 }
 0x56e   : > { %v1364_v5 = vsub.f32 %v3339_v54, %v1335_v21 }
 0x570   : > { %v1382_v6 = vmul.f32 1.442695, %v1364_v5  ;;  %v1333_v48 = vpop.xlane.xlu1 %1332 }
 0x571   : > { %v1363_v8 = vsub.f32 %v1270_v44, %v1333_v48  ;;  %v1331_v7 = vpop.xlane.xlu0 %1330 }
 0x572   : > { %3775 = vpow2.f32 %v1382_v6  ;;  %v1362_v49 = vsub.f32 %v1267_v58, %v1331_v7 }
 0x573   : > { %v1380_v17 = vmul.f32 1.442695, %v1363_v8 }
 0x574   : > { %v1378_v9 = vmul.f32 1.442695, %v1362_v49 }
 0x575   : > { %3777 = vpow2.f32 %v1380_v17  ;;  %v1337_v20 = vpop.xlane.xlu0 %1336 }
 0x576   : > { %3779 = vpow2.f32 %v1378_v9  ;;  %v1365_v51 = vsub.f32 %v3340_v61, %v1337_v20 }
 0x577   : > { %v1345_v41 = vpop.xlane.xlu1 %1344 }
 0x578   : > { %v1384_v14 = vmul.f32 1.442695, %v1365_v51 }
 0x579   : > { %v1343_v18 = vpop.xlane.xlu0 %1342 }
 0x57a   : > { %3781 = vpow2.f32 %v1384_v14  ;;  %v1368_v57 = vsub.f32 %v4825_v63, %v1343_v18 }
 0x57b   : > { %v1341_v62 = vpop.xlane.xlu1 %1340 }
 0x57c   : > { %v4869_v26 = vpop.eup %3775  ;;  %v1390_v22 = vmul.f32 1.442695, %v1368_v57  ;;  %v1367_v24 = vsub.f32 %v4832_v55, %v1341_v62 }
 0x57d   : > { %1414 = vadd.xlane.f32.xlu1 %v4869_v26  ;;  %v1339_v15 = vpop.xlane.xlu0 %1338 }
 0x57e   : > { %v1366_v23 = vsub.f32 %v4827_v29, %v1339_v15  ;;  %3783 = vpow2.f32 %v1390_v22  ;;  %v1388_v61 = vmul.f32 1.442695, %v1367_v24  ;;  %v4937_v24 = vld [vmem:[#allocation6 + $0x30] sm:$0xff]  }
 0x57f   : > { %v4872_v50 = vpop.eup %3777  ;;  %v1353_v10 = vpop.xlane.xlu1 %1352 }
 0x580   : > { %v4874_v52 = vpop.eup %3779  ;;  %1412 = vadd.xlane.f32.xlu0 %v4872_v50  ;;  %v1386_v58 = vmul.f32 1.442695, %v1366_v23 }
 0x581   : > { %1410 = vadd.xlane.f32.xlu1 %v4874_v52  ;;  %v1351_v19 = vpop.xlane.xlu0 %1350 }
 0x582   : > { %v1372_v44 = vsub.f32 %v4836_v43, %v1351_v19  ;;  %3785 = vpow2.f32 %v1386_v58 }
 0x583   : > { %v1349_v5 = vpop.xlane.xlu1 %1348  ;;  %3787 = vpow2.f32 %v1388_v61 }
 0x584   : > { %v4878_v56 = vpop.eup %3781  ;;  %v1398_v6 = vmul.f32 1.442695, %v1372_v44 }
 0x585   : > { %1416 = vadd.xlane.f32.xlu1 %v4878_v56  ;;  %v1347_v53 = vpop.xlane.xlu0 %1346 }
 0x586   : > { %v1370_v29 = vsub.f32 %v4839_v0, %v1347_v53  ;;  %v1371_v0 = vsub.f32 %v4844_v28, %v1349_v5 }
 0x587   : > { %v4898_v43 = vpop.permute.xlu1 %1674 }
 0x588   : > { %v1394_v7 = vmul.f32 1.442695, %v1370_v29  ;;  %v4896_v49 = vpop.eup %3783  ;;  %v1396_v51 = vmul.f32 1.442695, %v1371_v0 }
 0x589   : > { %v1359_v54 = vpop.xlane.xlu0 %1358 }
 0x58a   : > { %v1376_v63 = vsub.f32 %v4848_v27, %v1359_v54 }
 0x58c   : > { %v1406_v55 = vmul.f32 1.442695, %v1376_v63  ;;  %v4902_v9 = vpop.eup %3785  ;;  %v1709_v63 = vsel %vm686_vm0, %v4815_v11, 0 }
 0x58d   : > { %v1355_v48 = vpop.xlane.xlu0 %1354 }
 0x58e   : > { %v1374_v8 = vsub.f32 %v4851_v30, %v1355_v48  ;;  %v4904_v30 = vpop.eup %3787 }
 0x590   : > { %v1402_v27 = vmul.f32 1.442695, %v1374_v8 }
 0x596   : > { %1678 = vrot.lane.b32.xlu1 %v4535_v25, %s4209_s15  ;;  %1676 = vrot.lane.b32.xlu0 %v4883_v16, %s4209_s15  ;;  %v1369_v25 = vsub.f32 %v4829_v42, %v1345_v41  ;;  %v1373_v42 = vsub.f32 %v4841_v47, %v1353_v10  ;;  %v4941_v10 = vld [vmem:[#allocation6 + $0x38] sm:$0xff]  }
 0x598   : > { %v1392_v21 = vmul.f32 1.442695, %v1369_v25  ;;  %v1400_v17 = vmul.f32 1.442695, %v1373_v42 }
 0x59a   : > { %3789 = vpow2.f32 %v1392_v21 }
 0x59b   : > { %3791 = vpow2.f32 %v1398_v6 }
 0x59c   : > { %3793 = vpow2.f32 %v1406_v55 }
 0x59d   : > { %3795 = vpow2.f32 %v1394_v7 }
 0x59e   : > { %3797 = vpow2.f32 %v1402_v27 }
 0x59f   : > { %3799 = vpow2.f32 %v1400_v17 }
 0x5a4   : > { %v4909_v18 = vpop.eup %3789 }
 0x5a5   : > { %v4911_v28 = vpop.eup %3791 }
 0x5a6   : > { %v4916_v19 = vpop.eup %3793 }
 0x5a7   : > { %v4918_v57 = vpop.eup %3795 }
 0x5a8   : > { %v4922_v62 = vpop.eup %3797 }
 0x5a9   : > { %v4924_v53 = vpop.eup %3799 }
 0x5b5   : > { %1422 = vadd.xlane.f32.xlu0 %v4896_v49 }
 0x5b8   : > { %v1361_v20 = vpop.xlane.xlu1 %1360 }
 0x5b9   : > { %v1377_v47 = vsub.f32 %v4853_v1, %v1361_v20  ;;  %1418 = vadd.xlane.f32.xlu0 %v4902_v9 }
 0x5ba   : > { %1420 = vadd.xlane.f32.xlu1 %v4904_v30 }
 0x5bb   : > { %v1408_v14 = vmul.f32 1.442695, %v1377_v47 }
 0x5bc   : > { %v1357_v15 = vpop.xlane.xlu1 %1356 }
 0x5bd   : > { %3801 = vpow2.f32 %v1408_v14  ;;  %v1375_v41 = vsub.f32 %v4855_v2, %v1357_v15  ;;  %1424 = vadd.xlane.f32.xlu0 %v4909_v18 }
 0x5be   : > { %1430 = vadd.xlane.f32.xlu1 %v4911_v28  ;;  %3803 = vpow2.f32 %v1396_v51 }
 0x5bf   : > { %v1404_v1 = vmul.f32 1.442695, %v1375_v41 }
 0x5c1   : > { %1438 = vadd.xlane.f32.xlu0 %v4916_v19  ;;  %3805 = vpow2.f32 %v1404_v1 }
 0x5c2   : > { %1426 = vadd.xlane.f32.xlu1 %v4918_v57 }
 0x5c5   : > { %1434 = vadd.xlane.f32.xlu0 %v4922_v62 }
 0x5c6   : > { %1432 = vadd.xlane.f32.xlu1 %v4924_v53 }
 0x5c7   : > { %v4928_v2 = vpop.eup %3801 }
 0x5c8   : > { %v4930_v22 = vpop.eup %3803 }
 0x5c9   : > { %1440 = vadd.xlane.f32.xlu0 %v4928_v2 }
 0x5ca   : > { %1428 = vadd.xlane.f32.xlu1 %v4930_v22 }
 0x5cb   : > { %v4934_v23 = vpop.eup %3805 }
 0x5ce   : > { %1436 = vadd.xlane.f32.xlu1 %v4934_v23 }
 0x5df   : > { %1680 = vrot.lane.b32.xlu0 %v4937_v24, %s4209_s15  ;;  %1682 = vrot.lane.b32.xlu1 %v4941_v10, %s4209_s15 }
 0x5e3   : > { %1652 = vrot.lane.b32.xlu0 %v4563_v46, %s4209_s15  ;;  %1654 = vrot.lane.b32.xlu1 %v4561_v45, %s4209_s15 }
 0x5e7   : > { %1656 = vrot.lane.b32.xlu0 %v4571_v60, %s4209_s15  ;;  %1658 = vrot.lane.b32.xlu1 %v4569_v59, %s4209_s15 }
 0x5eb   : > { %1660 = vrot.lane.b32.xlu0 %v4579_v13, %s4209_s15  ;;  %1662 = vrot.lane.b32.xlu1 %v4577_v12, %s4209_s15 }
 0x5ef   : > { %1664 = vrot.lane.b32.xlu0 %v4587_v33, %s4209_s15  ;;  %1666 = vrot.lane.b32.xlu1 %v4585_v31, %s4209_s15 }
 0x5f3   : > { %1981 = vrot.lane.b32.xlu0 %v4593_v34, %s4209_s15  ;;  %1983 = vrot.lane.b32.xlu1 %v4595_v35, %s4209_s15  ;;  %v1673_v34 = vpop.permute.xlu0 %1672 }
 0x5f7   : > { %1985 = vrot.lane.b32.xlu0 %v4600_v32, %s4209_s15  ;;  %1987 = vrot.lane.b32.xlu1 %v4604_v36, %s4209_s15 }
 0x5fb   : > { %1989 = vrot.lane.b32.xlu0 %v4608_v37, %s4209_s15  ;;  %1991 = vrot.lane.b32.xlu1 %v4613_v38, %s4209_s15 }
 0x5ff   : > { %1993 = vrot.lane.b32.xlu0 %v4617_v39, %s4209_s15  ;;  %1995 = vrot.lane.b32.xlu1 %v4619_v40, %s4209_s15 }
 0x60a   : > { %v1415_v35 = vpop.xlane.xlu1 %1414 }
 0x60d   : > { %v1413_v54 = vpop.xlane.xlu0 %1412 }
 0x60e   : > { %3807 = vrcp.f32 %v1413_v54  ;;  %v1411_v32 = vpop.xlane.xlu1 %1410 }
 0x60f   : > { %3809 = vrcp.f32 %v1411_v32 }
 0x610   : > { %3811 = vrcp.f32 %v1415_v35 }
 0x611   : > { %v1677_v11 = vpop.permute.xlu0 %1676 }
 0x612   : > { %v1417_v36 = vpop.xlane.xlu1 %1416  ;;  %v1721_v6 = vsel %vm686_vm0, %v1677_v11, 0 }
 0x613   : > { %3813 = vrcp.f32 %v1417_v36 }
 0x618   : > { %v3808_v25 = vpop.eup %3807 }
 0x619   : > { %v3810_v37 = vpop.eup %3809  ;;  %v1459_v58 = vmul.f32 %v3808_v25, %v4872_v50  ;;  %v1712_v50 = vsel %vm686_vm0, %v4867_v4, 0 }
 0x61a   : > { %v1458_v38 = vmul.f32 %v3810_v37, %v4874_v52  ;;  %v3812_v61 = vpop.eup %3811  ;;  %v1718_v52 = vsel %vm686_vm0, %v4898_v43, 0 }
 0x61b   : > { %v1460_v40 = vmul.f32 %v3812_v61, %v4869_v26  ;;  %v1715_v26 = vsel %vm686_vm0, %v1673_v34, 0 }
 0x61c   : > { %v1474_v39 = vpack.c.bf16 %v1459_v58, %v1458_v38 }
 0x61d   : > { %v3814_v44 = vpop.eup %3813 }
 0x61e   : > { %v1461_v21 = vmul.f32 %v3814_v44, %v4878_v56  ;;  %3369 = vmatprep.mubr.bf16.mxu1 %v1474_v39 }
 0x620   : > { %v1475_v5 = vpack.c.bf16 %v1461_v21, %v1460_v40 }
 0x622   : > { %3370 = vmatmul.mubr.bf16.vlgmr.msra.gmra.mrb[16].mxu1 %v1475_v5 }
 0x623   : > { %3386 = vmatpush3.bf16.xpose.msra.mxu1 %v1709_v63 }
 0x624   : > { %3562 = vmatprep.subr.msk.bf16.mxu1 %vm686_vm0, %v4867_v4  ;;  %v1679_v4 = vpop.permute.xlu1 %1678 }
 0x625   : > { %v1724_v8 = vsel %vm686_vm0, %v1679_v4, 0 }
 0x62b   : > { %3388 = vmatpush3.bf16.xpose.msra.mxu1 %v1712_v50 }
 0x62c   : > { %3563 = vmatprep.subr.msk.bf16.mxu1 %vm686_vm0, %v1673_v34 }
 0x633   : > { %3390 = vmatpush3.bf16.xpose.msra.mxu1 %v1715_v26 }
 0x634   : > { %3564 = vmatprep.subr.msk.bf16.mxu1 %vm686_vm0, %v4898_v43 }
 0x63b   : > { %3392 = vmatpush3.bf16.xpose.msra.mxu1 %v1718_v52 }
 0x63c   : > { %3565 = vmatprep.subr.msk.bf16.mxu1 %vm686_vm0, %v1677_v11 }
 0x642   : > { %v1423_v56 = vpop.xlane.xlu0 %1422 }
 0x643   : > { %3394 = vmatpush3.bf16.xpose.msra.mxu1 %v1721_v6 }
 0x644   : > { %3566 = vmatprep.subr.msk.bf16.mxu1 %vm686_vm0, %v1679_v4 }
 0x646   : > { %v1419_v29 = vpop.xlane.xlu0 %1418 }
 0x647   : > { %3815 = vrcp.f32 %v1419_v29  ;;  %v1421_v48 = vpop.xlane.xlu1 %1420 }
 0x648   : > { %3817 = vrcp.f32 %v1421_v48 }
 0x649   : > { %3819 = vrcp.f32 %v1423_v56 }
 0x64a   : > { %v1425_v55 = vpop.xlane.xlu0 %1424 }
 0x64b   : > { %3821 = vrcp.f32 %v1425_v55  ;;  %3396 = vmatpush3.bf16.xpose.msra.mxu1 %v1724_v8  ;;  %v1431_v42 = vpop.xlane.xlu1 %1430 }
 0x64e   : > { %v1439_v7 = vpop.xlane.xlu0 %1438 }
 0x64f   : > { %v1427_v43 = vpop.xlane.xlu1 %1426 }
 0x651   : > { %v3816_v27 = vpop.eup %3815 }
 0x652   : > { %v3818_v17 = vpop.eup %3817  ;;  %v1435_v0 = vpop.xlane.xlu0 %1434  ;;  %v1462_v20 = vmul.f32 %v3816_v27, %v4902_v9 }
 0x653   : > { %v3820_v47 = vpop.eup %3819  ;;  %v1433_v51 = vpop.xlane.xlu1 %1432  ;;  %v1463_v14 = vmul.f32 %v3818_v17, %v4904_v30 }
 0x654   : > { %3823 = vrcp.f32 %v1433_v51  ;;  %v1464_v34 = vmul.f32 %v3820_v47, %v4896_v49 }
 0x655   : > { %v3822_v15 = vpop.eup %3821  ;;  %v1476_v41 = vpack.c.bf16 %v1463_v14, %v1462_v20  ;;  %3825 = vrcp.f32 %v1427_v43 }
 0x656   : > { %v1441_v1 = vpop.xlane.xlu0 %1440  ;;  %v1465_v35 = vmul.f32 %v3822_v15, %v4909_v18  ;;  %3827 = vrcp.f32 %v1431_v42 }
 0x657   : > { %3373 = vmatprep.mubr.bf16.mxu1 %v1476_v41  ;;  %v1429_v54 = vpop.xlane.xlu1 %1428 }
 0x658   : > { %3829 = vrcp.f32 %v1429_v54  ;;  %v1477_v32 = vpack.c.bf16 %v1465_v35, %v1464_v34 }
 0x659   : > { %3831 = vrcp.f32 %v1435_v0 }
 0x65a   : > { %v1681_v9 = vpop.permute.xlu0 %1680  ;;  %3374 = vmatmul.mubr.bf16.gmra.mrb[20].mxu1 %v1477_v32 }
 0x65b   : > { %v1437_v36 = vpop.xlane.xlu1 %1436  ;;  %3567 = vmatprep.subr.msk.bf16.mxu1 %vm686_vm0, %v1681_v9  ;;  %v1727_v30 = vsel %vm686_vm0, %v1681_v9, 0 }
 0x65c   : > { %3833 = vrcp.f32 %v1437_v36  ;;  %3398 = vmatpush3.bf16.xpose.msra.mxu1 %v1727_v30 }
 0x65d   : > { %3835 = vrcp.f32 %v1441_v1 }
 0x65e   : > { %v3824_v25 = vpop.eup %3823  ;;  %3837 = vrcp.f32 %v1439_v7 }
 0x65f   : > { %v1683_v49 = vpop.permute.xlu1 %1682  ;;  %v3826_v18 = vpop.eup %3825  ;;  %v1469_v61 = vmul.f32 %v3824_v25, %v4924_v53 }
 0x660   : > { %3568 = vmatprep.subr.msk.bf16.mxu1 %vm686_vm0, %v1683_v49  ;;  %v3828_v37 = vpop.eup %3827  ;;  %v1730_v58 = vsel %vm686_vm0, %v1683_v49, 0  ;;  %v1466_v39 = vmul.f32 %v3826_v18, %v4918_v57 }
 0x661   : > { %v1468_v21 = vmul.f32 %v3828_v37, %v4911_v28  ;;  %v1653_v28 = vpop.permute.xlu0 %1652 }
 0x662   : > { %v3830_v38 = vpop.eup %3829 }
 0x663   : > { %v1467_v44 = vmul.f32 %v3830_v38, %v4930_v22  ;;  %v3832_v40 = vpop.eup %3831  ;;  %v1479_v50 = vpack.c.bf16 %v1469_v61, %v1468_v21  ;;  %v1655_v4 = vpop.permute.xlu1 %1654 }
 0x664   : > { %3400 = vmatpush3.bf16.xpose.msra.mxu1 %v1730_v58  ;;  %v1470_v52 = vmul.f32 %v3832_v40, %v4922_v62  ;;  %v3971_v62 = vld [vmem:[#allocation6 + $0x8] sm:$0xff]  }
 0x665   : > { %v1478_v5 = vpack.c.bf16 %v1467_v44, %v1466_v39  ;;  %v1657_v29 = vpop.permute.xlu0 %1656  ;;  %2169 = vrot.lane.b32.xlu1 %v3971_v62, %s4210_s11 }
 0x666   : > { %v3834_v63 = vpop.eup %3833 }
 0x667   : > { %v3836_v26 = vpop.eup %3835  ;;  %3377 = vmatprep.mubr.bf16.mxu1 %v1478_v5  ;;  %v1471_v11 = vmul.f32 %v3834_v63, %v4934_v23  ;;  %v3972_v23 = vld [vmem:[#allocation6] sm:$0xff]  }
 0x668   : > { %3378 = vmatmul.mubr.bf16.gmra.mrb[24].mxu1 %v1479_v50  ;;  %v3838_v56 = vpop.eup %3837  ;;  %v1473_v57 = vmul.f32 %v3836_v26, %v4928_v2  ;;  %2167 = vrot.lane.b32.xlu0 %v3972_v23, %s4210_s11  ;;  %v1659_v2 = vpop.permute.xlu1 %1658 }
 0x669   : > { %v1480_v53 = vpack.c.bf16 %v1471_v11, %v1470_v52  ;;  %v1472_v22 = vmul.f32 %v3838_v56, %v4916_v19  ;;  %v1661_v19 = vpop.permute.xlu0 %1660 }
 0x66b   : > { %3381 = vmatprep.mubr.bf16.mxu1 %v1480_v53  ;;  %v1481_v6 = vpack.c.bf16 %v1473_v57, %v1472_v22 }
 0x66c   : > { %v1663_v48 = vpop.permute.xlu1 %1662 }
 0x66d   : > { %v1665_v55 = vpop.permute.xlu0 %1664 }
 0x670   : > { %3382 = vmatmul.mubr.bf16.gmra.mrb[28].mxu1 %v1481_v6  ;;  %v1667_v8 = vpop.permute.xlu1 %1666 }
 0x671   : > { %3401 = vmatprep.mubr.msk.bf16.mxu1 %vm686_vm0, %v1653_v28  ;;  %v1982_v42 = vpop.permute.xlu0 %1981 }
 0x672   : > { %3417 = vmatprep.subr.bf16.mxu0 %v1982_v42 }
 0x673   : > { %3418 = vmatpush3.bf16.msra.mxu0 %v1982_v42 }
 0x674   : > { %v1984_v7 = vpop.permute.xlu1 %1983 }
 0x675   : > { %3419 = vmatprep.subr.bf16.mxu0 %v1984_v7  ;;  %v1986_v0 = vpop.permute.xlu0 %1985 }
 0x677   : > { %3420 = vmatpush3.bf16.msra.mxu0 %v1984_v7 }
 0x678   : > { %3402 = vmatmul.mubr.msk.bf16.vlgmr.msra.gmra.mrb[32].mxu1 %vm686_vm0, %v1655_v4  ;;  %3421 = vmatprep.subr.bf16.mxu0 %v1986_v0  ;;  %v1988_v14 = vpop.permute.xlu1 %1987 }
 0x679   : > { %3405 = vmatprep.mubr.msk.bf16.mxu1 %vm686_vm0, %v1657_v29  ;;  %v1990_v15 = vpop.permute.xlu0 %1989 }
 0x67b   : > { %3422 = vmatpush3.bf16.msra.mxu0 %v1986_v0 }
 0x67c   : > { %3423 = vmatprep.subr.bf16.mxu0 %v1988_v14  ;;  %v1992_v41 = vpop.permute.xlu1 %1991 }
 0x67d   : > { %v1994_v1 = vpop.permute.xlu0 %1993 }
 0x67f   : > { %3424 = vmatpush3.bf16.msra.mxu0 %v1988_v14 }
 0x680   : > { %3406 = vmatmul.mubr.msk.bf16.gmra.mrb[36].mxu1 %vm686_vm0, %v1659_v2  ;;  %3425 = vmatprep.subr.bf16.mxu0 %v1990_v15  ;;  %v1996_v34 = vpop.permute.xlu1 %1995 }
 0x681   : > { %3409 = vmatprep.mubr.msk.bf16.mxu1 %vm686_vm0, %v1661_v19 }
 0x683   : > { %3426 = vmatpush3.bf16.msra.mxu0 %v1990_v15 }
 0x684   : > { %3427 = vmatprep.subr.bf16.mxu0 %v1992_v41 }
 0x687   : > { %3428 = vmatpush3.bf16.msra.mxu0 %v1992_v41 }
 0x688   : > { %3410 = vmatmul.mubr.msk.bf16.gmra.mrb[40].mxu1 %vm686_vm0, %v1663_v48  ;;  %3429 = vmatprep.subr.bf16.mxu0 %v1994_v1  ;;  %v3973_v48 = vld [vmem:[#allocation6 + $0x18] sm:$0xff]  }
 0x689   : > { %3413 = vmatprep.mubr.msk.bf16.mxu1 %vm686_vm0, %v1665_v55 }
 0x68b   : > { %3430 = vmatpush3.bf16.msra.mxu0 %v1994_v1 }
 0x68c   : > { %3431 = vmatprep.subr.bf16.mxu0 %v1996_v34 }
 0x68f   : > { %3432 = vmatpush3.bf16.msra.mxu0 %v1996_v34 }
 0x690   : > { %3414 = vmatmul.mubr.msk.bf16.gmra.mrb[44].mxu1 %vm686_vm0, %v1667_v8 }
 0x6d7   : > { %v5114_v55 = vpop.permute.xlu1 %2169 }
 0x6da   : > { %v5035_v35 = vpop.permute.xlu0 %2167 }
 0x6db   : > { %3569 = vmatprep.subr.msk.bf16.mxu0 %vm686_vm0, %v5035_v35 }
 0x6f5   : > { %v5023_v43 = vpop.f32.mrb[16].mxu1 }
 0x6f6   : > { %v5025_v27 = vpop.f32.mrb[17].mxu1 }
 0x6f7   : > { %v5027_v17 = vpop.f32.mrb[18].mxu1 }
 0x6f8   : > { %v5031_v47 = vpop.f32.mrb[19].mxu1 }
 0x72d   : > { %v5039_v54 = vpop.f32.mrb[20].mxu1 }
 0x72e   : > { %v5041_v32 = vpop.f32.mrb[21].mxu1 }
 0x72f   : > { %v5043_v9 = vpop.f32.mrb[22].mxu1 }
 0x730   : > { %v5047_v30 = vpop.f32.mrb[23].mxu1 }
 0x73b   : > { %v5051_v49 = vpop.f32.mrb[24].mxu1 }
 0x73c   : > { %v5053_v18 = vpop.f32.mrb[25].mxu1 }
 0x73d   : > { %v5055_v37 = vpop.f32.mrb[26].mxu1 }
 0x73e   : > { %v5059_v38 = vpop.f32.mrb[27].mxu1 }
 0x743   : > { %v5063_v39 = vpop.f32.mrb[28].mxu1 }
 0x744   : > { %v5065_v44 = vpop.f32.mrb[29].mxu1 }
 0x745   : > { %v5067_v40 = vpop.f32.mrb[30].mxu1 }
 0x746   : > { %v5071_v5 = vpop.f32.mrb[31].mxu1 }
 0x74b   : > { %v3403_v50 = vpop.f32.mrb[32].mxu1 }
 0x74c   : > { %1833 = vmax.xlane.f32.xlu0 %v3403_v50  ;;  %v1766_v26 = vpop.f32.mrb[33].mxu1 }
 0x74d   : > { %v3404_v52 = vpop.f32.mrb[34].mxu1 }
 0x74e   : > { %v1769_v11 = vpop.f32.mrb[35].mxu1 }
 0x74f   : > { %1831 = vmax.xlane.f32.xlu1 %v1769_v11 }
 0x750   : > { %1829 = vmax.xlane.f32.xlu0 %v1766_v26 }
 0x753   : > { %v5075_v56 = vpop.f32.mrb[36].mxu1 }
 0x754   : > { %1835 = vmax.xlane.f32.xlu0 %v3404_v52  ;;  %v5077_v53 = vpop.f32.mrb[37].mxu1 }
 0x755   : > { %v5079_v57 = vpop.f32.mrb[38].mxu1 }
 0x756   : > { %1843 = vmax.xlane.f32.xlu1 %v5079_v57  ;;  %v5082_v22 = vpop.f32.mrb[39].mxu1 }
 0x758   : > { %1841 = vmax.xlane.f32.xlu0 %v5075_v56 }
 0x75a   : > { %1839 = vmax.xlane.f32.xlu1 %v5082_v22 }
 0x75b   : > { %v5086_v6 = vpop.f32.mrb[40].mxu1 }
 0x75c   : > { %1837 = vmax.xlane.f32.xlu0 %v5077_v53  ;;  %v5089_v28 = vpop.f32.mrb[41].mxu1 }
 0x75d   : > { %v5091_v4 = vpop.f32.mrb[42].mxu1 }
 0x75e   : > { %1851 = vmax.xlane.f32.xlu1 %v5091_v4  ;;  %v5094_v29 = vpop.f32.mrb[43].mxu1 }
 0x760   : > { %1849 = vmax.xlane.f32.xlu0 %v5086_v6 }
 0x762   : > { %1847 = vmax.xlane.f32.xlu1 %v5094_v29 }
 0x763   : > { %v5098_v62 = vpop.f32.mrb[44].mxu1 }
 0x764   : > { %1845 = vmax.xlane.f32.xlu0 %v5089_v28  ;;  %v5101_v23 = vpop.f32.mrb[45].mxu1 }
 0x765   : > { %v5103_v2 = vpop.f32.mrb[46].mxu1 }
 0x766   : > { %v5105_v19 = vpop.f32.mrb[47].mxu1 }
 0x768   : > { %1857 = vmax.xlane.f32.xlu0 %v5098_v62 }
 0x76c   : > { %1853 = vmax.xlane.f32.xlu0 %v5101_v23 }
 0x773   : > { %2173 = vrot.lane.b32.xlu1 %v3973_v48, %s4210_s11 }
 0x782   : > { %2171 = vrot.lane.b32.xlu0 %v4861_v3, %s4210_s11 }
 0x797   : > { %1859 = vmax.xlane.f32.xlu1 %v5103_v2 }
 0x79b   : > { %1855 = vmax.xlane.f32.xlu1 %v5105_v19 }
 0x7d9   : > { %v1834_v8 = vpop.xlane.xlu0 %1833 }
 0x7da   : > { %v1863_v42 = vsub.f32 %v3403_v50, %v1834_v8 }
 0x7dc   : > { %v1881_v7 = vmul.f32 1.442695, %v1863_v42  ;;  %v1832_v0 = vpop.xlane.xlu1 %1831 }
 0x7dd   : > { %v1862_v14 = vsub.f32 %v1769_v11, %v1832_v0  ;;  %v1830_v15 = vpop.xlane.xlu0 %1829 }
 0x7de   : > { %3839 = vpow2.f32 %v1881_v7  ;;  %v1861_v41 = vsub.f32 %v1766_v26, %v1830_v15 }
 0x7df   : > { %v1879_v1 = vmul.f32 1.442695, %v1862_v14 }
 0x7e0   : > { %v1877_v34 = vmul.f32 1.442695, %v1861_v41 }
 0x7e1   : > { %3841 = vpow2.f32 %v1879_v1  ;;  %v1836_v48 = vpop.xlane.xlu0 %1835 }
 0x7e2   : > { %3843 = vpow2.f32 %v1877_v34  ;;  %v1864_v3 = vsub.f32 %v3404_v52, %v1836_v48  ;;  %v3974_v52 = vld [vmem:[#allocation6 + $0x28] sm:$0xff]  }
 0x7e3   : > { %v1844_v8 = vpop.xlane.xlu1 %1843 }
 0x7e4   : > { %v1883_v63 = vmul.f32 1.442695, %v1864_v3  ;;  %v1868_v3 = vsub.f32 %v5079_v57, %v1844_v8 }
 0x7e5   : > { %v1842_v11 = vpop.xlane.xlu0 %1841 }
 0x7e6   : > { %3845 = vpow2.f32 %v1883_v63  ;;  %v1867_v7 = vsub.f32 %v5075_v56, %v1842_v11  ;;  %v1891_v51 = vmul.f32 1.442695, %v1868_v3 }
 0x7e7   : > { %v1840_v0 = vpop.xlane.xlu1 %1839 }
 0x7e8   : > { %v5116_v21 = vpop.eup %3839  ;;  %v1889_v15 = vmul.f32 1.442695, %v1867_v7  ;;  %v1866_v1 = vsub.f32 %v5082_v22, %v1840_v0 }
 0x7e9   : > { %1913 = vadd.xlane.f32.xlu1 %v5116_v21  ;;  %v1838_v63 = vpop.xlane.xlu0 %1837 }
 0x7ea   : > { %v1865_v41 = vsub.f32 %v5077_v53, %v1838_v63  ;;  %3847 = vpow2.f32 %v1889_v15  ;;  %v1887_v25 = vmul.f32 1.442695, %v1866_v1 }
 0x7eb   : > { %v5119_v61 = vpop.eup %3841  ;;  %v1852_v34 = vpop.xlane.xlu1 %1851 }
 0x7ec   : > { %v5121_v50 = vpop.eup %3843  ;;  %1911 = vadd.xlane.f32.xlu0 %v5119_v61  ;;  %v1872_v57 = vsub.f32 %v5091_v4, %v1852_v34 }
 0x7ed   : > { %1909 = vadd.xlane.f32.xlu1 %v5121_v50  ;;  %v1850_v42 = vpop.xlane.xlu0 %1849 }
 0x7ef   : > { %v1848_v58 = vpop.xlane.xlu1 %1847 }
 0x7f0   : > { %v5125_v26 = vpop.eup %3845 }
 0x7f1   : > { %1915 = vadd.xlane.f32.xlu1 %v5125_v26  ;;  %v1846_v14 = vpop.xlane.xlu0 %1845 }
 0x7f2   : > { %v1869_v53 = vsub.f32 %v5089_v28, %v1846_v14  ;;  %v1870_v28 = vsub.f32 %v5094_v29, %v1848_v58 }
 0x7f4   : > { %v1893_v8 = vmul.f32 1.442695, %v1869_v53  ;;  %v5140_v0 = vpop.eup %3847  ;;  %v1895_v14 = vmul.f32 1.442695, %v1870_v28 }
 0x7f5   : > { %v1858_v48 = vpop.xlane.xlu0 %1857 }
 0x7f6   : > { %v1875_v56 = vsub.f32 %v5098_v62, %v1858_v48  ;;  %v1899_v62 = vmul.f32 1.442695, %v1872_v57 }
 0x7f8   : > { %v1905_v22 = vmul.f32 1.442695, %v1875_v56 }
 0x7f9   : > { %v1854_v63 = vpop.xlane.xlu0 %1853 }
 0x7fa   : > { %v1873_v7 = vsub.f32 %v5101_v23, %v1854_v63 }
 0x802   : > { %2177 = vrot.lane.b32.xlu1 %v3974_v52, %s4210_s11  ;;  %2175 = vrot.lane.b32.xlu0 %v4883_v16, %s4210_s11  ;;  %v1885_v52 = vmul.f32 1.442695, %v1865_v41  ;;  %v1871_v16 = vsub.f32 %v5086_v6, %v1850_v42  ;;  %v5142_v6 = vpop.permute.xlu1 %2173 }
 0x804   : > { %3849 = vpow2.f32 %v1885_v52  ;;  %v1897_v11 = vmul.f32 1.442695, %v1871_v16 }
 0x805   : > { %3851 = vpow2.f32 %v1887_v25  ;;  %v1901_v25 = vmul.f32 1.442695, %v1873_v7 }
 0x806   : > { %3853 = vpow2.f32 %v1891_v51 }
 0x807   : > { %3855 = vpow2.f32 %v1897_v11 }
 0x808   : > { %3857 = vpow2.f32 %v1905_v22 }
 0x809   : > { %3859 = vpow2.f32 %v1893_v8 }
 0x80a   : > { %3861 = vpow2.f32 %v1901_v25 }
 0x80b   : > { %3863 = vpow2.f32 %v1899_v62  ;;  %v2208_v62 = vsel %vm686_vm0, %v5035_v35, 0 }
 0x80e   : > { %v5146_v51 = vpop.eup %3849 }
 0x80f   : > { %v5148_v23 = vpop.eup %3851 }
 0x810   : > { %v5153_v41 = vpop.eup %3853 }
 0x811   : > { %v5155_v58 = vpop.eup %3855 }
 0x812   : > { %v5160_v34 = vpop.eup %3857 }
 0x813   : > { %v5162_v48 = vpop.eup %3859 }
 0x814   : > { %v5166_v3 = vpop.eup %3861 }
 0x815   : > { %v5168_v52 = vpop.eup %3863 }
 0x821   : > { %1921 = vadd.xlane.f32.xlu0 %v5140_v0 }
 0x824   : > { %v1860_v42 = vpop.xlane.xlu1 %1859 }
 0x825   : > { %v1876_v4 = vsub.f32 %v5103_v2, %v1860_v42  ;;  %1917 = vadd.xlane.f32.xlu0 %v5146_v51 }
 0x826   : > { %1919 = vadd.xlane.f32.xlu1 %v5148_v23 }
 0x827   : > { %v1907_v15 = vmul.f32 1.442695, %v1876_v4 }
 0x828   : > { %v1856_v1 = vpop.xlane.xlu1 %1855 }
 0x829   : > { %3865 = vpow2.f32 %v1907_v15  ;;  %v1874_v29 = vsub.f32 %v5105_v19, %v1856_v1  ;;  %1923 = vadd.xlane.f32.xlu0 %v5153_v41 }
 0x82a   : > { %1929 = vadd.xlane.f32.xlu1 %v5155_v58  ;;  %3867 = vpow2.f32 %v1895_v14 }
 0x82b   : > { %v1903_v2 = vmul.f32 1.442695, %v1874_v29 }
 0x82d   : > { %1937 = vadd.xlane.f32.xlu0 %v5160_v34  ;;  %3869 = vpow2.f32 %v1903_v2 }
 0x82e   : > { %1925 = vadd.xlane.f32.xlu1 %v5162_v48 }
 0x831   : > { %1933 = vadd.xlane.f32.xlu0 %v5166_v3 }
 0x832   : > { %1931 = vadd.xlane.f32.xlu1 %v5168_v52 }
 0x833   : > { %v5172_v19 = vpop.eup %3865 }
 0x834   : > { %v5174_v16 = vpop.eup %3867 }
 0x835   : > { %1939 = vadd.xlane.f32.xlu0 %v5172_v19 }
 0x836   : > { %1927 = vadd.xlane.f32.xlu1 %v5174_v16 }
 0x837   : > { %v5178_v56 = vpop.eup %3869 }
 0x83a   : > { %1935 = vadd.xlane.f32.xlu1 %v5178_v56 }
 0x84b   : > { %2179 = vrot.lane.b32.xlu0 %v4937_v24, %s4210_s11  ;;  %2181 = vrot.lane.b32.xlu1 %v4941_v10, %s4210_s11 }
 0x84f   : > { %2151 = vrot.lane.b32.xlu0 %v4563_v46, %s4210_s11  ;;  %2153 = vrot.lane.b32.xlu1 %v4561_v45, %s4210_s11  ;;  %v3975_v46 = vld [vmem:[#allocation8] sm:$0xff]   ;;  %v3976_v45 = vld [vmem:[#allocation8 + $0x8] sm:$0xff]  }
 0x853   : > { %2155 = vrot.lane.b32.xlu0 %v4571_v60, %s4210_s11  ;;  %2157 = vrot.lane.b32.xlu1 %v4569_v59, %s4210_s11  ;;  %v3977_v60 = vld [vmem:[#allocation8 + $0x10] sm:$0xff]   ;;  %v2172_v59 = vpop.permute.xlu0 %2171 }
 0x857   : > { %2159 = vrot.lane.b32.xlu0 %v4579_v13, %s4210_s11  ;;  %2161 = vrot.lane.b32.xlu1 %v4577_v12, %s4210_s11 }
 0x85b   : > { %2163 = vrot.lane.b32.xlu0 %v4587_v33, %s4210_s11  ;;  %2165 = vrot.lane.b32.xlu1 %v4585_v31, %s4210_s11 }
 0x85f   : > { %2480 = vrot.lane.b32.xlu0 %v3975_v46, %s4210_s11  ;;  %2482 = vrot.lane.b32.xlu1 %v3976_v45, %s4210_s11 }
 0x863   : > { %2484 = vrot.lane.b32.xlu0 %v3977_v60, %s4210_s11 }
 0x876   : > { %v1914_v13 = vpop.xlane.xlu1 %1913 }
 0x879   : > { %v1912_v24 = vpop.xlane.xlu0 %1911 }
 0x87a   : > { %3871 = vrcp.f32 %v1912_v24  ;;  %v1910_v12 = vpop.xlane.xlu1 %1909 }
 0x87b   : > { %3873 = vrcp.f32 %v1910_v12 }
 0x87c   : > { %3875 = vrcp.f32 %v1914_v13 }
 0x87d   : > { %v2176_v35 = vpop.permute.xlu0 %2175 }
 0x87e   : > { %v1916_v33 = vpop.xlane.xlu1 %1915 }
 0x87f   : > { %3877 = vrcp.f32 %v1916_v33 }
 0x884   : > { %v3872_v10 = vpop.eup %3871 }
 0x885   : > { %v3874_v31 = vpop.eup %3873  ;;  %v1958_v11 = vmul.f32 %v3872_v10, %v5119_v61  ;;  %v2211_v61 = vsel %vm686_vm0, %v5114_v55, 0 }
 0x886   : > { %v1957_v53 = vmul.f32 %v3874_v31, %v5121_v50  ;;  %v3876_v63 = vpop.eup %3875  ;;  %v2217_v50 = vsel %vm686_vm0, %v5142_v6, 0 }
 0x887   : > { %v1959_v57 = vmul.f32 %v3876_v63, %v5116_v21  ;;  %v2214_v21 = vsel %vm686_vm0, %v2172_v59, 0 }
 0x888   : > { %v1973_v22 = vpack.c.bf16 %v1958_v11, %v1957_v53 }
 0x889   : > { %v3878_v7 = vpop.eup %3877 }
 0x88a   : > { %v1960_v8 = vmul.f32 %v3878_v7, %v5125_v26  ;;  %3433 = vmatprep.mubr.bf16.mxu0 %v1973_v22  ;;  %v2220_v26 = vsel %vm686_vm0, %v2176_v35, 0 }
 0x88c   : > { %v1974_v25 = vpack.c.bf16 %v1960_v8, %v1959_v57 }
 0x88e   : > { %3434 = vmatmul.mubr.bf16.vlgmr.msra.gmra.mrb[48].mxu0 %v1974_v25 }
 0x88f   : > { %3450 = vmatpush3.bf16.xpose.msra.mxu0 %v2208_v62 }
 0x890   : > { %3570 = vmatprep.subr.msk.bf16.mxu0 %vm686_vm0, %v5114_v55  ;;  %v2178_v55 = vpop.permute.xlu1 %2177 }
 0x891   : > { %v2223_v14 = vsel %vm686_vm0, %v2178_v55, 0 }
 0x897   : > { %3452 = vmatpush3.bf16.xpose.msra.mxu0 %v2211_v61 }
 0x898   : > { %3571 = vmatprep.subr.msk.bf16.mxu0 %vm686_vm0, %v2172_v59 }
 0x89f   : > { %3454 = vmatpush3.bf16.xpose.msra.mxu0 %v2214_v21 }
 0x8a0   : > { %3572 = vmatprep.subr.msk.bf16.mxu0 %vm686_vm0, %v5142_v6 }
 0x8a7   : > { %3456 = vmatpush3.bf16.xpose.msra.mxu0 %v2217_v50 }
 0x8a8   : > { %3573 = vmatprep.subr.msk.bf16.mxu0 %vm686_vm0, %v2176_v35 }
 0x8ae   : > { %v1922_v28 = vpop.xlane.xlu0 %1921 }
 0x8af   : > { %3458 = vmatpush3.bf16.xpose.msra.mxu0 %v2220_v26 }
 0x8b0   : > { %3574 = vmatprep.subr.msk.bf16.mxu0 %vm686_vm0, %v2178_v55 }
 0x8b2   : > { %v1918_v42 = vpop.xlane.xlu0 %1917 }
 0x8b3   : > { %3879 = vrcp.f32 %v1918_v42  ;;  %v1920_v4 = vpop.xlane.xlu1 %1919 }
 0x8b4   : > { %3881 = vrcp.f32 %v1920_v4 }
 0x8b5   : > { %3883 = vrcp.f32 %v1922_v28 }
 0x8b6   : > { %v1924_v15 = vpop.xlane.xlu0 %1923 }
 0x8b7   : > { %3885 = vrcp.f32 %v1924_v15  ;;  %3460 = vmatpush3.bf16.xpose.msra.mxu0 %v2223_v14  ;;  %v1930_v6 = vpop.xlane.xlu1 %1929 }
 0x8ba   : > { %v1938_v1 = vpop.xlane.xlu0 %1937 }
 0x8bb   : > { %v1926_v29 = vpop.xlane.xlu1 %1925 }
 0x8bd   : > { %v3880_v2 = vpop.eup %3879 }
 0x8be   : > { %v3882_v46 = vpop.eup %3881  ;;  %v1934_v45 = vpop.xlane.xlu0 %1933  ;;  %v1961_v60 = vmul.f32 %v3880_v2, %v5146_v51 }
 0x8bf   : > { %v3884_v59 = vpop.eup %3883  ;;  %v1932_v13 = vpop.xlane.xlu1 %1931  ;;  %v1962_v24 = vmul.f32 %v3882_v46, %v5148_v23 }
 0x8c0   : > { %3887 = vrcp.f32 %v1932_v13  ;;  %v1963_v31 = vmul.f32 %v3884_v59, %v5140_v0 }
 0x8c1   : > { %v3886_v12 = vpop.eup %3885  ;;  %v1975_v33 = vpack.c.bf16 %v1962_v24, %v1961_v60  ;;  %3889 = vrcp.f32 %v1926_v29 }
 0x8c2   : > { %v1940_v10 = vpop.xlane.xlu0 %1939  ;;  %v1964_v11 = vmul.f32 %v3886_v12, %v5153_v41  ;;  %3891 = vrcp.f32 %v1930_v6 }
 0x8c3   : > { %3437 = vmatprep.mubr.bf16.mxu0 %v1975_v33  ;;  %v1928_v53 = vpop.xlane.xlu1 %1927 }
 0x8c4   : > { %3893 = vrcp.f32 %v1928_v53  ;;  %v1976_v63 = vpack.c.bf16 %v1964_v11, %v1963_v31 }
 0x8c5   : > { %3895 = vrcp.f32 %v1934_v45 }
 0x8c6   : > { %v2180_v51 = vpop.permute.xlu0 %2179  ;;  %3438 = vmatmul.mubr.bf16.gmra.mrb[52].mxu0 %v1976_v63 }
 0x8c7   : > { %v2226_v22 = vsel %vm686_vm0, %v2180_v51, 0  ;;  %v1936_v23 = vpop.xlane.xlu1 %1935  ;;  %3575 = vmatprep.subr.msk.bf16.mxu0 %vm686_vm0, %v2180_v51 }
 0x8c8   : > { %3897 = vrcp.f32 %v1936_v23  ;;  %3462 = vmatpush3.bf16.xpose.msra.mxu0 %v2226_v22 }
 0x8c9   : > { %3899 = vrcp.f32 %v1940_v10 }
 0x8ca   : > { %v3888_v7 = vpop.eup %3887  ;;  %3901 = vrcp.f32 %v1938_v1 }
 0x8cb   : > { %v2182_v0 = vpop.permute.xlu1 %2181  ;;  %v3890_v41 = vpop.eup %3889  ;;  %v1968_v62 = vmul.f32 %v3888_v7, %v5168_v52 }
 0x8cc   : > { %3576 = vmatprep.subr.msk.bf16.mxu0 %vm686_vm0, %v2182_v0  ;;  %v3892_v57 = vpop.eup %3891  ;;  %v2229_v8 = vsel %vm686_vm0, %v2182_v0, 0  ;;  %v1965_v61 = vmul.f32 %v3890_v41, %v5162_v48 }
 0x8cd   : > { %v1967_v35 = vmul.f32 %v3892_v57, %v5155_v58  ;;  %v2152_v58 = vpop.permute.xlu0 %2151 }
 0x8ce   : > { %v3894_v25 = vpop.eup %3893 }
 0x8cf   : > { %v1966_v21 = vmul.f32 %v3894_v25, %v5174_v16  ;;  %v3896_v50 = vpop.eup %3895  ;;  %v1978_v55 = vpack.c.bf16 %v1968_v62, %v1967_v35  ;;  %v2154_v1 = vpop.permute.xlu1 %2153 }
 0x8d0   : > { %3464 = vmatpush3.bf16.xpose.msra.mxu0 %v2229_v8  ;;  %v1969_v4 = vmul.f32 %v3896_v50, %v5166_v3 }
 0x8d1   : > { %v1977_v26 = vpack.c.bf16 %v1966_v21, %v1965_v61  ;;  %v2156_v29 = vpop.permute.xlu0 %2155 }
 0x8d2   : > { %v3898_v28 = vpop.eup %3897 }
 0x8d3   : > { %v3900_v42 = vpop.eup %3899  ;;  %3441 = vmatprep.mubr.bf16.mxu0 %v1977_v26  ;;  %v1970_v14 = vmul.f32 %v3898_v28, %v5178_v56  ;;  %v2158_v3 = vpop.permute.xlu1 %2157 }
 0x8d4   : > { %3442 = vmatmul.mubr.bf16.gmra.mrb[56].mxu0 %v1978_v55  ;;  %v3902_v15 = vpop.eup %3901  ;;  %v1972_v48 = vmul.f32 %v3900_v42, %v5172_v19 }
 0x8d5   : > { %v1979_v52 = vpack.c.bf16 %v1970_v14, %v1969_v4  ;;  %v1971_v16 = vmul.f32 %v3902_v15, %v5160_v34  ;;  %v2160_v56 = vpop.permute.xlu0 %2159 }
 0x8d7   : > { %3445 = vmatprep.mubr.bf16.mxu0 %v1979_v52  ;;  %v1980_v6 = vpack.c.bf16 %v1972_v48, %v1971_v16  ;;  %v2162_v19 = vpop.permute.xlu1 %2161 }
 0x8d9   : > { %v2164_v2 = vpop.permute.xlu0 %2163 }
 0x8db   : > { %v2166_v34 = vpop.permute.xlu1 %2165 }
 0x8dc   : > { %3446 = vmatmul.mubr.bf16.gmra.mrb[60].mxu0 %v1980_v6 }
 0x8dd   : > { %3465 = vmatprep.mubr.msk.bf16.mxu0 %vm686_vm0, %v2152_v58  ;;  %v2481_v12 = vpop.permute.xlu0 %2480 }
 0x8de   : > { %3481 = vmatprep.subr.bf16.mxu1 %v2481_v12 }
 0x8df   : > { %3482 = vmatpush3.bf16.msra.mxu1 %v2481_v12  ;;  %v2483_v33 = vpop.permute.xlu1 %2482 }
 0x8e0   : > { %3483 = vmatprep.subr.bf16.mxu1 %v2483_v33 }
 0x8e1   : > { %v2485_v10 = vpop.permute.xlu0 %2484 }
 0x8e3   : > { %3484 = vmatpush3.bf16.msra.mxu1 %v2483_v33 }
 0x8e4   : > { %3466 = vmatmul.mubr.msk.bf16.vlgmr.msra.gmra.mrb[64].mxu0 %vm686_vm0, %v2154_v1  ;;  %3485 = vmatprep.subr.bf16.mxu1 %v2485_v10 }
 0x8e5   : > { %3469 = vmatprep.mubr.msk.bf16.mxu0 %vm686_vm0, %v2156_v29 }
 0x8e7   : > { %3486 = vmatpush3.bf16.msra.mxu1 %v2485_v10 }
 0x8ec   : > { %3470 = vmatmul.mubr.msk.bf16.gmra.mrb[68].mxu0 %vm686_vm0, %v2158_v3 }
 0x8ed   : > { %3473 = vmatprep.mubr.msk.bf16.mxu0 %vm686_vm0, %v2160_v56 }
 0x8f4   : > { %3474 = vmatmul.mubr.msk.bf16.gmra.mrb[72].mxu0 %vm686_vm0, %v2162_v19  ;;  %v3978_v19 = vld [vmem:[#allocation8 + $0x20] sm:$0xff]  }
 0x8f5   : > { %3477 = vmatprep.mubr.msk.bf16.mxu0 %vm686_vm0, %v2164_v2  ;;  %v3979_v2 = vld [vmem:[#allocation8 + $0x18] sm:$0xff]  }
 0x8fc   : > { %3478 = vmatmul.mubr.msk.bf16.gmra.mrb[76].mxu0 %vm686_vm0, %v2166_v34  ;;  %v3980_v34 = vld [vmem:[#allocation8 + $0x28] sm:$0xff]  }
 0x961   : > { %v5248_v46 = vpop.f32.mrb[48].mxu0 }
 0x962   : > { %v5250_v45 = vpop.f32.mrb[49].mxu0 }
 0x963   : > { %v5252_v60 = vpop.f32.mrb[50].mxu0 }
 0x964   : > { %v5256_v13 = vpop.f32.mrb[51].mxu0 }
 0x999   : > { %v5260_v31 = vpop.f32.mrb[52].mxu0 }
 0x99a   : > { %v5262_v11 = vpop.f32.mrb[53].mxu0 }
 0x99b   : > { %v5264_v53 = vpop.f32.mrb[54].mxu0 }
 0x99c   : > { %v5268_v51 = vpop.f32.mrb[55].mxu0 }
 0x9a7   : > { %v5272_v23 = vpop.f32.mrb[56].mxu0 }
 0x9a8   : > { %v5274_v7 = vpop.f32.mrb[57].mxu0 }
 0x9a9   : > { %v5276_v0 = vpop.f32.mrb[58].mxu0 }
 0x9aa   : > { %v5280_v57 = vpop.f32.mrb[59].mxu0 }
 0x9af   : > { %v5284_v25 = vpop.f32.mrb[60].mxu0 }
 0x9b0   : > { %v5286_v62 = vpop.f32.mrb[61].mxu0 }
 0x9b1   : > { %5598 = vst [vmem:[#allocation18_spill] sm:$0xff] %v5286_v62  ;;  %v5288_v61 = vpop.f32.mrb[62].mxu0 }
 0x9b2   : > { %v5292_v50 = vpop.f32.mrb[63].mxu0 }
 0x9b7   : > { %v3467_v26 = vpop.f32.mrb[64].mxu0 }
 0x9b8   : > { %2332 = vmax.xlane.f32.xlu0 %v3467_v26  ;;  %v2265_v28 = vpop.f32.mrb[65].mxu0 }
 0x9b9   : > { %v3468_v55 = vpop.f32.mrb[66].mxu0 }
 0x9ba   : > { %v2268_v42 = vpop.f32.mrb[67].mxu0 }
 0x9bb   : > { %2330 = vmax.xlane.f32.xlu1 %v2268_v42 }
 0x9bc   : > { %2328 = vmax.xlane.f32.xlu0 %v2265_v28 }
 0x9bf   : > { %v3471_v4 = vpop.f32.mrb[68].mxu0 }
 0x9c0   : > { %2334 = vmax.xlane.f32.xlu0 %v3468_v55  ;;  %v2281_v14 = vpop.f32.mrb[69].mxu0 }
 0x9c1   : > { %v5296_v15 = vpop.f32.mrb[70].mxu0 }
 0x9c2   : > { %2342 = vmax.xlane.f32.xlu1 %v5296_v15  ;;  %v2284_v52 = vpop.f32.mrb[71].mxu0 }
 0x9c4   : > { %2340 = vmax.xlane.f32.xlu0 %v3471_v4 }
 0x9c6   : > { %2338 = vmax.xlane.f32.xlu1 %v2284_v52 }
 0x9c7   : > { %v5299_v48 = vpop.f32.mrb[72].mxu0 }
 0x9c8   : > { %2336 = vmax.xlane.f32.xlu0 %v2281_v14  ;;  %v5301_v16 = vpop.f32.mrb[73].mxu0 }
 0x9c9   : > { %v5303_v6 = vpop.f32.mrb[74].mxu0 }
 0x9ca   : > { %2350 = vmax.xlane.f32.xlu1 %v5303_v6  ;;  %v5306_v58 = vpop.f32.mrb[75].mxu0 }
 0x9cc   : > { %2348 = vmax.xlane.f32.xlu0 %v5299_v48 }
 0x9ce   : > { %2346 = vmax.xlane.f32.xlu1 %v5306_v58 }
 0x9cf   : > { %v5310_v1 = vpop.f32.mrb[76].mxu0 }
 0x9d0   : > { %2344 = vmax.xlane.f32.xlu0 %v5301_v16  ;;  %v5313_v29 = vpop.f32.mrb[77].mxu0 }
 0x9d1   : > { %v5315_v3 = vpop.f32.mrb[78].mxu0 }
 0x9d2   : > { %v5317_v56 = vpop.f32.mrb[79].mxu0 }
 0x9d4   : > { %2356 = vmax.xlane.f32.xlu0 %v5310_v1 }
 0x9d8   : > { %2352 = vmax.xlane.f32.xlu0 %v5313_v29 }
 0x9df   : > { %2488 = vrot.lane.b32.xlu1 %v3978_v19, %s4210_s11 }
 0x9ee   : > { %2486 = vrot.lane.b32.xlu0 %v3979_v2, %s4210_s11 }
 0xa03   : > { %2358 = vmax.xlane.f32.xlu1 %v5315_v3 }
 0xa07   : > { %2354 = vmax.xlane.f32.xlu1 %v5317_v56 }
 0xa18   : > { %2490 = vrot.lane.b32.xlu1 %v3980_v34, %s4210_s11 }
 0xa45   : > { %v2333_v12 = vpop.xlane.xlu0 %2332 }
 0xa46   : > { %v2362_v33 = vsub.f32 %v3467_v26, %v2333_v12 }
 0xa48   : > { %v2380_v10 = vmul.f32 1.442695, %v2362_v33  ;;  %v2331_v21 = vpop.xlane.xlu1 %2330 }
 0xa49   : > { %v2329_v35 = vpop.xlane.xlu0 %2328  ;;  %v2361_v22 = vsub.f32 %v2268_v42, %v2331_v21 }
 0xa4a   : > { %3903 = vpow2.f32 %v2380_v10  ;;  %v2360_v8 = vsub.f32 %v2265_v28, %v2329_v35 }
 0xa4b   : > { %v2378_v59 = vmul.f32 1.442695, %v2361_v22 }
 0xa4c   : > { %v2376_v41 = vmul.f32 1.442695, %v2360_v8 }
 0xa4d   : > { %v2335_v19 = vpop.xlane.xlu0 %2334 }
 0xa4e   : > { %3905 = vpow2.f32 %v2376_v41  ;;  %v2363_v63 = vsub.f32 %v3468_v55, %v2335_v19 }
 0xa4f   : > { %v2343_v2 = vpop.xlane.xlu1 %2342 }
 0xa50   : > { %v2382_v36 = vmul.f32 1.442695, %v2363_v63  ;;  %v2367_v8 = vsub.f32 %v5296_v15, %v2343_v2 }
 0xa51   : > { %v2341_v24 = vpop.xlane.xlu0 %2340 }
 0xa52   : > { %3907 = vpow2.f32 %v2382_v36  ;;  %v2366_v20 = vsub.f32 %v3471_v4, %v2341_v24  ;;  %v2390_v24 = vmul.f32 1.442695, %v2367_v8 }
 0xa53   : > { %v2339_v62 = vpop.xlane.xlu1 %2338  ;;  %3909 = vpow2.f32 %v2378_v59 }
 0xa54   : > { %v5326_v34 = vpop.eup %3903  ;;  %v2388_v26 = vmul.f32 1.442695, %v2366_v20  ;;  %v2365_v12 = vsub.f32 %v2284_v52, %v2339_v62 }
 0xa55   : > { %v2337_v33 = vpop.xlane.xlu0 %2336  ;;  %2412 = vadd.xlane.f32.xlu1 %v5326_v34 }
 0xa56   : > { %3911 = vpow2.f32 %v2388_v26  ;;  %v2386_v41 = vmul.f32 1.442695, %v2365_v12  ;;  %v2364_v21 = vsub.f32 %v2281_v14, %v2337_v33 }
 0xa57   : > { %v2351_v22 = vpop.xlane.xlu1 %2350 }
 0xa58   : > { %v5330_v35 = vpop.eup %3905  ;;  %v2384_v63 = vmul.f32 1.442695, %v2364_v21  ;;  %3913 = vpow2.f32 %v2386_v41  ;;  %v2371_v62 = vsub.f32 %v5303_v6, %v2351_v22 }
 0xa59   : > { %v2349_v36 = vpop.xlane.xlu0 %2348  ;;  %2408 = vadd.xlane.f32.xlu1 %v5330_v35 }
 0xa5a   : > { %3915 = vpow2.f32 %v2384_v63  ;;  %v2370_v20 = vsub.f32 %v5299_v48, %v2349_v36  ;;  %v2398_v10 = vmul.f32 1.442695, %v2371_v62  ;;  %v3981_v62 = vld [vmem:[#allocation8 + $0x38] sm:$0xff]  }
 0xa5b   : > { %3917 = vpow2.f32 %v2390_v24  ;;  %v2347_v42 = vpop.xlane.xlu1 %2346 }
 0xa5c   : > { %v5334_v59 = vpop.eup %3907  ;;  %v2396_v28 = vmul.f32 1.442695, %v2370_v20  ;;  %v2369_v48 = vsub.f32 %v5306_v58, %v2347_v42  ;;  %v5600_v42 = vpack.c.bf16 %v5256_v13, %v5250_v45  ;;  %v5603_v45 = vpack.c.bf16 %v5264_v53, %v5260_v31 }
 0xa5d   : > { %v2345_v55 = vpop.xlane.xlu0 %2344  ;;  %2414 = vadd.xlane.f32.xlu1 %v5334_v59  ;;  %v5339_v14 = vpop.eup %3909  ;;  %v5605_v31 = vpack.c.bf16 %v5031_v47, %v5025_v27  ;;  %v5608_v53 = vpack.c.bf16 %v5059_v38, %v5053_v18 }
 0xa5e   : > { %v2368_v4 = vsub.f32 %v5301_v16, %v2345_v55  ;;  %3919 = vpow2.f32 %v2396_v28  ;;  %v2394_v12 = vmul.f32 1.442695, %v2369_v48  ;;  %v5599_v28 = vpack.c.bf16 %v5027_v17, %v5023_v43  ;;  %v3982_v55 = vld [vmem:[#allocation8 + $0x30] sm:$0xff]  }
 0xa5f   : > { %v2489_v63 = vpop.permute.xlu1 %2488  ;;  %v5602_v43 = vpack.c.bf16 %v5043_v9, %v5039_v54 }
 0xa60   : > { %v5341_v15 = vpop.eup %3911  ;;  %v2392_v52 = vmul.f32 1.442695, %v2368_v4 }
 0xa61   : > { %v2357_v19 = vpop.xlane.xlu0 %2356  ;;  %2420 = vadd.xlane.f32.xlu0 %v5341_v15  ;;  %2410 = vadd.xlane.f32.xlu1 %v5339_v14 }
 0xa62   : > { %3921 = vpow2.f32 %v2392_v52  ;;  %v2374_v6 = vsub.f32 %v5310_v1, %v2357_v19  ;;  %v5347_v2 = vpop.eup %3913  ;;  %v5601_v52 = vpack.c.bf16 %v5252_v60, %v5248_v46  ;;  %v5604_v60 = vpack.c.bf16 %v5055_v37, %v5051_v49 }
 0xa63   : > { %3923 = vpow2.f32 %v2398_v10  ;;  %v5606_v49 = vpack.c.bf16 %v5047_v30, %v5041_v32  ;;  %v5607_v37 = vpack.c.bf16 %v5268_v51, %v5262_v11 }
 0xa64   : > { %v5349_v16 = vpop.eup %3915  ;;  %v2404_v26 = vmul.f32 1.442695, %v2374_v6 }
 0xa65   : > { %2416 = vadd.xlane.f32.xlu0 %v5349_v16  ;;  %v2353_v33 = vpop.xlane.xlu0 %2352  ;;  %2418 = vadd.xlane.f32.xlu1 %v5347_v2  ;;  %v5354_v8 = vpop.eup %3917 }
 0xa66   : > { %3925 = vpow2.f32 %v2404_v26  ;;  %v2372_v58 = vsub.f32 %v5313_v29, %v2353_v33 }
 0xa67   : > { %3927 = vpow2.f32 %v2394_v12 }
 0xa68   : > { %v2400_v41 = vmul.f32 1.442695, %v2372_v58  ;;  %v5357_v21 = vpop.eup %3919 }
 0xa69   : > { %v2487_v1 = vpop.permute.xlu0 %2486  ;;  %2422 = vadd.xlane.f32.xlu0 %v5354_v8 }
 0xa6a   : > { %3929 = vpow2.f32 %v2400_v41  ;;  %3487 = vmatprep.subr.bf16.mxu1 %v2487_v1 }
 0xa6b   : > { %3488 = vmatpush3.bf16.msra.mxu1 %v2487_v1 }
 0xa6c   : > { %v5359_v22 = vpop.eup %3921  ;;  %3489 = vmatprep.subr.bf16.mxu1 %v2489_v63 }
 0xa6d   : > { %2428 = vadd.xlane.f32.xlu0 %v5357_v21  ;;  %2424 = vadd.xlane.f32.xlu1 %v5359_v22  ;;  %v5363_v29 = vpop.eup %3923 }
 0xa6f   : > { %3490 = vmatpush3.bf16.msra.mxu1 %v2489_v63 }
 0xa70   : > { %v5365_v36 = vpop.eup %3925 }
 0xa71   : > { %2436 = vadd.xlane.f32.xlu1 %v5365_v36  ;;  %2430 = vadd.xlane.f32.xlu0 %v5363_v29  ;;  %v5369_v24 = vpop.eup %3927 }
 0xa74   : > { %v5371_v20 = vpop.eup %3929 }
 0xa75   : > { %2432 = vadd.xlane.f32.xlu1 %v5371_v20  ;;  %2426 = vadd.xlane.f32.xlu0 %v5369_v24 }
 0xa86   : > { %2494 = vrot.lane.b32.xlu1 %v3981_v62, %s4210_s11 }
 0xa8a   : > { %1621 = vrot.lane.b32.xlu1 %v5599_v28, %s4210_s11 }
 0xa8b   : > { %2492 = vrot.lane.b32.xlu0 %v3982_v55, %s4210_s11 }
 0xa8e   : > { %2118 = vrot.lane.b32.xlu1 %v5600_v42, %s4209_s15 }
 0xa90   : > { %v2359_v4 = vpop.xlane.xlu1 %2358 }
 0xa91   : > { %v2375_v13 = vsub.f32 %v5315_v3, %v2359_v4 }
 0xa92   : > { %2120 = vrot.lane.b32.xlu1 %v5601_v52, %s4209_s15 }
 0xa93   : > { %v2406_v54 = vmul.f32 1.442695, %v2375_v13 }
 0xa94   : > { %v2355_v10 = vpop.xlane.xlu1 %2354 }
 0xa95   : > { %v2373_v17 = vsub.f32 %v5317_v56, %v2355_v10 }
 0xa96   : > { %1625 = vrot.lane.b32.xlu1 %v5602_v43, %s4210_s11 }
 0xa97   : > { %v2402_v46 = vmul.f32 1.442695, %v2373_v17 }
 0xa98   : > { %v2491_v48 = vpop.permute.xlu1 %2490 }
 0xa99   : > { %3491 = vmatprep.subr.bf16.mxu1 %v2491_v48  ;;  %3931 = vpow2.f32 %v2402_v46 }
 0xa9a   : > { %2124 = vrot.lane.b32.xlu1 %v5603_v45, %s4209_s15  ;;  %3492 = vmatpush3.bf16.msra.mxu1 %v2491_v48  ;;  %3933 = vpow2.f32 %v2406_v54 }
 0xa9e   : > { %1629 = vrot.lane.b32.xlu1 %v5604_v60, %s4210_s11 }
 0xaa3   : > { %v5403_v9 = vpop.eup %3931 }
 0xaa4   : > { %v5406_v56 = vpop.eup %3933 }
 0xaaa   : > { %2434 = vadd.xlane.f32.xlu0 %v5403_v9 }
 0xaae   : > { %2438 = vadd.xlane.f32.xlu0 %v5406_v56 }
 0xac4   : > { %1619 = vrot.lane.b32.xlu0 %v5605_v31, %s4210_s11 }
 0xac8   : > { %1623 = vrot.lane.b32.xlu0 %v5606_v49, %s4210_s11 }
 0xacc   : > { %2122 = vrot.lane.b32.xlu0 %v5607_v37, %s4209_s15 }
 0xad0   : > { %1627 = vrot.lane.b32.xlu0 %v5608_v53, %s4210_s11 }
 0xae2   : > { %v2413_v3 = vpop.xlane.xlu1 %2412 }
 0xae6   : > { %v2409_v19 = vpop.xlane.xlu1 %2408 }
 0xae7   : > { %3935 = vrcp.f32 %v2409_v19 }
 0xaea   : > { %v2415_v6 = vpop.xlane.xlu1 %2414 }
 0xaee   : > { %v2421_v27 = vpop.xlane.xlu0 %2420  ;;  %v2411_v47 = vpop.xlane.xlu1 %2410 }
 0xaef   : > { %3937 = vrcp.f32 %v2411_v47 }
 0xaf0   : > { %3939 = vrcp.f32 %v2415_v6 }
 0xaf1   : > { %v3936_v12 = vpop.eup %3935 }
 0xaf2   : > { %v2417_v26 = vpop.xlane.xlu0 %2416  ;;  %v2419_v32 = vpop.xlane.xlu1 %2418  ;;  %v2456_v51 = vmul.f32 %v3936_v12, %v5330_v35 }
 0xaf3   : > { %3941 = vrcp.f32 %v2417_v26 }
 0xaf4   : > { %3943 = vrcp.f32 %v2419_v32 }
 0xaf5   : > { %3945 = vrcp.f32 %v2413_v3 }
 0xaf6   : > { %v2423_v30 = vpop.xlane.xlu0 %2422 }
 0xaf7   : > { %3947 = vrcp.f32 %v2423_v30 }
 0xaf9   : > { %v3938_v33 = vpop.eup %3937 }
 0xafa   : > { %v2429_v58 = vpop.xlane.xlu0 %2428  ;;  %v2425_v11 = vpop.xlane.xlu1 %2424  ;;  %v2457_v18 = vmul.f32 %v3938_v33, %v5339_v14 }
 0xafb   : > { %v3940_v28 = vpop.eup %3939 }
 0xafc   : > { %v2472_v38 = vpack.c.bf16 %v2457_v18, %v2456_v51  ;;  %v2459_v14 = vmul.f32 %v3940_v28, %v5334_v59  ;;  %v3705_v28 = vld [vmem:[#allocation11 + $0x10] sm:$0xff]  }
 0xafd   : > { %v3942_v55 = vpop.eup %3941 }
 0xafe   : > { %v2431_v41 = vpop.xlane.xlu0 %2430  ;;  %v2437_v1 = vpop.xlane.xlu1 %2436  ;;  %3497 = vmatprep.mubr.bf16.mxu1 %v2472_v38  ;;  %v2460_v43 = vmul.f32 %v3942_v55, %v5349_v16  ;;  %v3706_v55 = vld [vmem:[#allocation11 + $0x18] sm:$0xff]  }
 0xaff   : > { %v3944_v52 = vpop.eup %3943 }
 0xb00   : > { %v3946_v35 = vpop.eup %3945  ;;  %v2461_v17 = vmul.f32 %v3944_v52, %v5347_v2 }
 0xb01   : > { %v2458_v48 = vmul.f32 %v3946_v35, %v5326_v34  ;;  %v3948_v13 = vpop.eup %3947 }
 0xb02   : > { %v2427_v63 = vpop.xlane.xlu0 %2426  ;;  %v2433_v62 = vpop.xlane.xlu1 %2432  ;;  %v2474_v60 = vpack.c.bf16 %v2461_v17, %v2460_v43  ;;  %v2463_v16 = vmul.f32 %v3948_v13, %v5354_v8 }
 0xb03   : > { %3949 = vrcp.f32 %v2427_v63  ;;  %v2473_v45 = vpack.c.bf16 %v2459_v14, %v2458_v48 }
 0xb04   : > { %3951 = vrcp.f32 %v2421_v27 }
 0xb05   : > { %3953 = vrcp.f32 %v2425_v11 }
 0xb06   : > { %v2493_v42 = vpop.permute.xlu0 %2492  ;;  %v2495_v4 = vpop.permute.xlu1 %2494  ;;  %3955 = vrcp.f32 %v2431_v41 }
 0xb07   : > { %3493 = vmatprep.subr.bf16.mxu1 %v2493_v42  ;;  %3957 = vrcp.f32 %v2429_v58 }
 0xb08   : > { %3494 = vmatpush3.bf16.msra.mxu1 %v2493_v42  ;;  %3959 = vrcp.f32 %v2433_v62  ;;  %v3709_v42 = vld [vmem:[#allocation11 + $0x30] sm:$0xff]  }
 0xb09   : > { %3495 = vmatprep.subr.bf16.mxu1 %v2495_v4 }
 0xb0a   : > { %v1622_v10 = vpop.permute.xlu1 %1621 }
 0xb0b   : > { %1645 = vst.msk [vmem:[#allocation2 + $0x8] sm:$0xff] %vm1643_vm1, %v1622_v10 }
 0xb0c   : > { %3496 = vmatpush3.bf16.msra.mxu1 %v2495_v4  ;;  %v3710_v4 = vld [vmem:[#allocation11 + $0x38] sm:$0xff]  }
 0xb0d   : > { %v3950_v54 = vpop.eup %3949 }
 0xb0e   : > { %v2119_v46 = vpop.permute.xlu1 %2118  ;;  %v3952_v59 = vpop.eup %3951  ;;  %v2465_v34 = vmul.f32 %v3950_v54, %v5369_v24 }
 0xb0f   : > { %3498 = vmatmul.mubr.bf16.vlgmr.msra.gmra.mrb[48].mxu1 %v2473_v45  ;;  %v3954_v31 = vpop.eup %3953  ;;  %v2462_v49 = vmul.f32 %v3952_v59, %v5341_v15  ;;  %v5609_v45 = vpack.c.bf16 %v5276_v0, %v5272_v23  ;;  %v5611_v23 = vpack.c.bf16 %v5067_v40, %v5063_v39  ;;  %v5614_v39 = vld [vmem:[#allocation18_spill] sm:$0xff] }
 0xb10   : > { %3501 = vmatprep.mubr.bf16.mxu1 %v2474_v60  ;;  %v2464_v37 = vmul.f32 %v3954_v31, %v5359_v22  ;;  %v3956_v3 = vpop.eup %3955  ;;  %v5615_v40 = vpack.c.bf16 %v5292_v50, %v5614_v39 }
 0xb11   : > { %v2475_v53 = vpack.c.bf16 %v2463_v16, %v2462_v49  ;;  %v3958_v27 = vpop.eup %3957  ;;  %v2467_v8 = vmul.f32 %v3956_v3, %v5363_v29 }
 0xb12   : > { %v2121_v2 = vpop.permute.xlu1 %2120  ;;  %v2476_v6 = vpack.c.bf16 %v2465_v34, %v2464_v37  ;;  %v2466_v24 = vmul.f32 %v3958_v27, %v5357_v21  ;;  %v3960_v12 = vpop.eup %3959  ;;  %v5613_v37 = vpack.c.bf16 %v5288_v61, %v5284_v25 }
 0xb13   : > { %2144 = vst.msk [vmem:[#allocation2 + $0x8] sm:$0xff] %vm2142_vm2, %v2121_v2  ;;  %v2468_v21 = vmul.f32 %v3960_v12, %v5371_v20  ;;  %v3703_v20 = vld [vmem:[#allocation11] sm:$0xff]  }
 0xb14   : > { %v2477_v26 = vpack.c.bf16 %v2467_v8, %v2466_v24  ;;  %3513 = vmatprep.subr.bf16.mxu1 %v3703_v20 }
 0xb15   : > { %3514 = vmatpush3.bf16.msra.mxu1 %v3703_v20 }
 0xb16   : > { %v1626_v19 = vpop.permute.xlu1 %1625 }
 0xb17   : > { %1647 = vst.msk [vmem:[#allocation2 + $0x18] sm:$0xff] %vm1643_vm1, %v1626_v19  ;;  %3502 = vmatmul.mubr.bf16.gmra.mrb[52].mxu1 %v2475_v53 }
 0xb18   : > { %3505 = vmatprep.mubr.bf16.mxu1 %v2476_v6 }
 0xb1a   : > { %v2125_v47 = vpop.permute.xlu1 %2124 }
 0xb1b   : > { %2146 = vst.msk [vmem:[#allocation2 + $0x18] sm:$0xff] %vm2142_vm2, %v2125_v47 }
 0xb1e   : > { %v1630_v15 = vpop.permute.xlu1 %1629 }
 0xb1f   : > { %1649 = vst.msk [vmem:[#allocation2 + $0x28] sm:$0xff] %vm1643_vm1, %v1630_v15  ;;  %3506 = vmatmul.mubr.bf16.gmra.mrb[56].mxu1 %v2477_v26 }
 0xb37   : > { %v2435_v22 = vpop.xlane.xlu0 %2434 }
 0xb38   : > { %3961 = vrcp.f32 %v2435_v22 }
 0xb39   : > { %3963 = vrcp.f32 %v2437_v1 }
 0xb3b   : > { %v2439_v32 = vpop.xlane.xlu0 %2438 }
 0xb3c   : > { %3965 = vrcp.f32 %v2439_v32 }
 0xb3f   : > { %v1620_v30 = vpop.permute.xlu0 %1619 }
 0xb40   : > { %1644 = vst.msk [vmem:[#allocation2] sm:$0xff] %vm1643_vm1, %v1620_v30 }
 0xb41   : > { %2143 = vst.msk [vmem:[#allocation2] sm:$0xff] %vm2142_vm2, %v2119_v46  ;;  %v5610_v46 = vpack.c.bf16 %v5280_v57, %v5274_v7  ;;  %v5612_v7 = vpack.c.bf16 %v5071_v5, %v5065_v44 }
 0xb42   : > { %v3962_v29 = vpop.eup %3961 }
 0xb43   : > { %v1624_v33 = vpop.permute.xlu0 %1623  ;;  %v2469_v58 = vmul.f32 %v3962_v29, %v5403_v9  ;;  %v3964_v11 = vpop.eup %3963  ;;  %v3704_v9 = vld [vmem:[#allocation11 + $0x8] sm:$0xff]  }
 0xb44   : > { %1646 = vst.msk [vmem:[#allocation2 + $0x10] sm:$0xff] %vm1643_vm1, %v1624_v33  ;;  %v2470_v41 = vmul.f32 %v3964_v11, %v5365_v36  ;;  %3515 = vmatprep.subr.bf16.mxu1 %v3704_v9  ;;  %v3707_v36 = vld [vmem:[#allocation11 + $0x20] sm:$0xff]  }
 0xb45   : > { %v2478_v51 = vpack.c.bf16 %v2469_v58, %v2468_v21  ;;  %3516 = vmatpush3.bf16.msra.mxu1 %v3704_v9 }
 0xb46   : > { %v3966_v18 = vpop.eup %3965  ;;  %3517 = vmatprep.subr.bf16.mxu1 %v3705_v28 }
 0xb47   : > { %v2123_v38 = vpop.permute.xlu0 %2122  ;;  %3509 = vmatprep.mubr.bf16.mxu1 %v2478_v51  ;;  %v2471_v1 = vmul.f32 %v3966_v18, %v5406_v56  ;;  %v3708_v56 = vld [vmem:[#allocation11 + $0x28] sm:$0xff]  }
 0xb48   : > { %2145 = vst.msk [vmem:[#allocation2 + $0x10] sm:$0xff] %vm2142_vm2, %v2123_v38 }
 0xb49   : > { %v2479_v63 = vpack.c.bf16 %v2471_v1, %v2470_v41  ;;  %3518 = vmatpush3.bf16.msra.mxu1 %v3705_v28  ;;  %v3049_v1 = vld [vmem:[%s5576_s6] ss:$0 sm:$0xff] }
 0xb4a   : > { %3519 = vmatprep.subr.bf16.mxu1 %v3706_v55 }
 0xb4b   : > { %v1628_v62 = vpop.permute.xlu0 %1627  ;;  %3510 = vmatmul.mubr.bf16.gmra.mrb[60].mxu1 %v2479_v63 }
 0xb4c   : > { %1648 = vst.msk [vmem:[#allocation2 + $0x20] sm:$0xff] %vm1643_vm1, %v1628_v62 }
 0xb4d   : > { %3520 = vmatpush3.bf16.msra.mxu1 %v3706_v55 }
 0xb4e   : > { %3521 = vmatprep.subr.bf16.mxu1 %v3707_v36 }
 0xb51   : > { %3522 = vmatpush3.bf16.msra.mxu1 %v3707_v36 }
 0xb52   : > { %3523 = vmatprep.subr.bf16.mxu1 %v3708_v56 }
 0xb55   : > { %3524 = vmatpush3.bf16.msra.mxu1 %v3708_v56 }
 0xb56   : > { %3525 = vmatprep.subr.bf16.mxu1 %v3709_v42 }
 0xb59   : > { %3526 = vmatpush3.bf16.msra.mxu1 %v3709_v42 }
 0xb5a   : > { %3527 = vmatprep.subr.bf16.mxu1 %v3710_v4 }
 0xb5d   : > { %3528 = vmatpush3.bf16.msra.mxu1 %v3710_v4 }
 0xbe2   : > { %v3499_v52 = vpop.f32.mrb[48].mxu1 }
 0xbe3   : > { %v2538_v35 = vpop.f32.mrb[49].mxu1 }
 0xbe4   : > { %v3500_v14 = vpop.f32.mrb[50].mxu1 }
 0xbe5   : > { %v2602_v10 = vpack.c.bf16 %v3500_v14, %v3499_v52  ;;  %v2541_v43 = vpop.f32.mrb[51].mxu1 }
 0xbe6   : > { %v2601_v17 = vpack.c.bf16 %v2541_v43, %v2538_v35 }
 0xbe7   : > { %2619 = vrot.lane.b32.xlu1 %v2602_v10, %s4208_s30 }
 0xbe8   : > { %2617 = vrot.lane.b32.xlu0 %v2601_v17, %s4208_s30 }
 0xbea   : > { %v3503_v48 = vpop.f32.mrb[52].mxu1 }
 0xbeb   : > { %2128 = vrot.lane.b32.xlu1 %v5609_v45, %s4209_s15  ;;  %v2554_v13 = vpop.f32.mrb[53].mxu1 }
 0xbec   : > { %2126 = vrot.lane.b32.xlu0 %v5610_v46, %s4209_s15  ;;  %v3504_v60 = vpop.f32.mrb[54].mxu1 }
 0xbed   : > { %v2604_v54 = vpack.c.bf16 %v3504_v60, %v3503_v48  ;;  %v2557_v59 = vpop.f32.mrb[55].mxu1 }
 0xbee   : > { %v2603_v31 = vpack.c.bf16 %v2557_v59, %v2554_v13 }
 0xbef   : > { %2623 = vrot.lane.b32.xlu1 %v2604_v54, %s4208_s30 }
 0xbf0   : > { %2621 = vrot.lane.b32.xlu0 %v2603_v31, %s4208_s30 }
 0xbf2   : > { %v3507_v16 = vpop.f32.mrb[56].mxu1 }
 0xbf3   : > { %1633 = vrot.lane.b32.xlu1 %v5611_v23, %s4210_s11  ;;  %v2570_v0 = vpop.f32.mrb[57].mxu1 }
 0xbf4   : > { %1631 = vrot.lane.b32.xlu0 %v5612_v7, %s4210_s11  ;;  %v3508_v57 = vpop.f32.mrb[58].mxu1 }
 0xbf5   : > { %v2606_v2 = vpack.c.bf16 %v3508_v57, %v3507_v16  ;;  %v2573_v34 = vpop.f32.mrb[59].mxu1 }
 0xbf6   : > { %v2605_v49 = vpack.c.bf16 %v2573_v34, %v2570_v0 }
 0xbf7   : > { %2627 = vrot.lane.b32.xlu1 %v2606_v2, %s4208_s30 }
 0xbf8   : > { %2625 = vrot.lane.b32.xlu0 %v2605_v49, %s4208_s30 }
 0xbfb   : > { %2132 = vrot.lane.b32.xlu1 %v5613_v37, %s4209_s15 }
 0xbfc   : > { %2130 = vrot.lane.b32.xlu0 %v5615_v40, %s4209_s15  ;;  %s4131_s15 = scalar_lea.vmem %s4130_s13, 4096 }
 0xc1e   : > { %v3511_v44 = vpop.f32.mrb[60].mxu1 }
 0xc1f   : > { %v2586_v5 = vpop.f32.mrb[61].mxu1 }
 0xc20   : > { %v3512_v53 = vpop.f32.mrb[62].mxu1 }
 0xc21   : > { %v2608_v3 = vpack.c.bf16 %v3512_v53, %v3511_v44  ;;  %v2589_v19 = vpop.f32.mrb[63].mxu1 }
 0xc22   : > { %v2607_v6 = vpack.c.bf16 %v2589_v19, %v2586_v5 }
 0xc23   : > { %2631 = vrot.lane.b32.xlu1 %v2608_v3, %s4208_s30 }
 0xc24   : > { %2629 = vrot.lane.b32.xlu0 %v2607_v6, %s4208_s30  ;;  %s4125_s30 = scalar_lea.vmem %s5523_s10, 2048 }
 0xc25   : > { %p4126_p3 = scmp.ne.s32.totalorder %s5523_s10, %s4125_s30  ;;  %p4133_p1 = scmp.lt.s32.totalorder %s4131_s15, %s4125_s30 }
 0xc27   : > { %p4127_p5 = pnand %p4126_p3, %p4425_p10  ;;  %p4134_p2 = por %p4133_p1, %p4132_p12 }
 0xc29   : > { %p4128_p7 = pneg %p4127_p5 }
 0xc2b   : > { %p4135_p13 = pnand %p4134_p2, %p4128_p7 }
 0xc59   : > { %v2620_v27 = vpop.permute.xlu1 %2619 }
 0xc5a   : > { %2643 = vst.msk [vmem:[#allocation2 + $0x8] sm:$0xff] %vm2641_vm3, %v2620_v27  ;;  %v2618_v25 = vpop.permute.xlu0 %2617 }
 0xc5b   : > { %2642 = vst.msk [vmem:[#allocation2] sm:$0xff] %vm2641_vm3, %v2618_v25 }
 0xc5d   : > { %v2129_v61 = vpop.permute.xlu1 %2128 }
 0xc5e   : > { %2148 = vst.msk [vmem:[#allocation2 + $0x28] sm:$0xff] %vm2142_vm2, %v2129_v61  ;;  %v2127_v50 = vpop.permute.xlu0 %2126 }
 0xc5f   : > { %2147 = vst.msk [vmem:[#allocation2 + $0x20] sm:$0xff] %vm2142_vm2, %v2127_v50 }
 0xc61   : > { %v2624_v8 = vpop.permute.xlu1 %2623  ;;  %v2651_v26 = vld [vmem:[#allocation2 + $0x8] sm:$0xff] }
 0xc62   : > { %2645 = vst.msk [vmem:[#allocation2 + $0x18] sm:$0xff] %vm2641_vm3, %v2624_v8  ;;  %v2622_v47 = vpop.permute.xlu0 %2621  ;;  %v2650_v24 = vld [vmem:[#allocation2] sm:$0xff] }
 0xc63   : > { %2644 = vst.msk [vmem:[#allocation2 + $0x10] sm:$0xff] %vm2641_vm3, %v2622_v47  ;;  %3529 = vmatprep.mubr.bf16.mxu1 %v2650_v24 }
 0xc64   : > { %3530 = vmatmul.mubr.bf16.vlgmr.msra.gmra.mrb[64].mxu1 %v2651_v26 }
 0xc65   : > { %v1634_v15 = vpop.permute.xlu1 %1633 }
 0xc66   : > { %1651 = vst.msk [vmem:[#allocation2 + $0x38] sm:$0xff] %vm1643_vm1, %v1634_v15  ;;  %v1632_v22 = vpop.permute.xlu0 %1631 }
 0xc67   : > { %1650 = vst.msk [vmem:[#allocation2 + $0x30] sm:$0xff] %vm1643_vm1, %v1632_v22 }
 0xc69   : > { %v2628_v32 = vpop.permute.xlu1 %2627  ;;  %v2653_v29 = vld [vmem:[#allocation2 + $0x18] sm:$0xff] }
 0xc6a   : > { %2647 = vst.msk [vmem:[#allocation2 + $0x28] sm:$0xff] %vm2641_vm3, %v2628_v32  ;;  %v2626_v30 = vpop.permute.xlu0 %2625  ;;  %v2652_v12 = vld [vmem:[#allocation2 + $0x10] sm:$0xff] }
 0xc6b   : > { %2646 = vst.msk [vmem:[#allocation2 + $0x20] sm:$0xff] %vm2641_vm3, %v2626_v30  ;;  %3533 = vmatprep.mubr.bf16.mxu1 %v2652_v12 }
 0xc6c   : > { %3534 = vmatmul.mubr.bf16.gmra.mrb[68].mxu1 %v2653_v29 }
 0xc6d   : > { %v2133_v33 = vpop.permute.xlu1 %2132 }
 0xc6e   : > { %2150 = vst.msk [vmem:[#allocation2 + $0x38] sm:$0xff] %vm2142_vm2, %v2133_v33  ;;  %v2131_v21 = vpop.permute.xlu0 %2130 }
 0xc6f   : > { %2149 = vst.msk [vmem:[#allocation2 + $0x30] sm:$0xff] %vm2142_vm2, %v2131_v21 }
 0xc71   : > { %v2655_v11 = vld [vmem:[#allocation2 + $0x28] sm:$0xff] }
 0xc72   : > { %v2654_v58 = vld [vmem:[#allocation2 + $0x20] sm:$0xff] }
 0xc73   : > { %3537 = vmatprep.mubr.bf16.mxu1 %v2654_v58 }
 0xc74   : > { %3538 = vmatmul.mubr.bf16.gmra.mrb[72].mxu1 %v2655_v11 }
 0xc95   : > { %v2632_v51 = vpop.permute.xlu1 %2631 }
 0xc96   : > { %2649 = vst.msk [vmem:[#allocation2 + $0x38] sm:$0xff] %vm2641_vm3, %v2632_v51  ;;  %v2630_v18 = vpop.permute.xlu0 %2629 }
 0xc97   : > { %2648 = vst.msk [vmem:[#allocation2 + $0x30] sm:$0xff] %vm2641_vm3, %v2630_v18 }
 0xc9d   : > { %v2657_v41 = vld [vmem:[#allocation2 + $0x38] sm:$0xff] }
 0xc9e   : > { %v2656_v38 = vld [vmem:[#allocation2 + $0x30] sm:$0xff] }
 0xc9f   : > { %3541 = vmatprep.mubr.bf16.mxu1 %v2656_v38 }
 0xca0   : > { %3542 = vmatmul.mubr.bf16.gmra.mrb[76].mxu1 %v2657_v41 }
 0xd37   : > { %v3531_v63 = vpop.f32.mrb[64].mxu1 }
 0xd38   : > { %v2772_v62 = vadd.f32 %v3531_v63, %v3049_v1  ;;  %v2763_v20 = vpop.f32.mrb[65].mxu1 }
 0xd39   : > { %v2764_v9 = vadd.f32 %v3049_v1, %v2763_v20  ;;  %v3532_v28 = vpop.f32.mrb[66].mxu1 }
 0xd3a   : > { %2828 = vst [vmem:[%s5501_s23 + $0x10] sm:$0xff] %v2772_v62  ;;  %v2775_v55 = vadd.f32 %v3532_v28, %v3049_v1  ;;  %v2766_v36 = vpop.f32.mrb[67].mxu1 }
 0xd3b   : > { %2826 = vst [vmem:[%s5501_s23] sm:$0xff] %v2764_v9  ;;  %v2767_v56 = vadd.f32 %v3049_v1, %v2766_v36 }
 0xd3c   : > { %2829 = vst [vmem:[%s5501_s23 + $0x18] sm:$0xff] %v2775_v55 }
 0xd3d   : > { %2827 = vst [vmem:[%s5501_s23 + $0x8] sm:$0xff] %v2767_v56 }
 0xd3f   : > { %v3535_v42 = vpop.f32.mrb[68].mxu1 }
 0xd40   : > { %v2788_v4 = vadd.f32 %v3535_v42, %v3049_v1  ;;  %v2779_v52 = vpop.f32.mrb[69].mxu1 }
 0xd41   : > { %v2780_v35 = vadd.f32 %v3049_v1, %v2779_v52  ;;  %v3536_v14 = vpop.f32.mrb[70].mxu1 }
 0xd42   : > { %2832 = vst [vmem:[%s5501_s23 + $0x30] sm:$0xff] %v2788_v4  ;;  %v2791_v10 = vadd.f32 %v3536_v14, %v3049_v1  ;;  %v2782_v43 = vpop.f32.mrb[71].mxu1 }
 0xd43   : > { %2830 = vst [vmem:[%s5501_s23 + $0x20] sm:$0xff] %v2780_v35  ;;  %v2783_v17 = vadd.f32 %v3049_v1, %v2782_v43 }
 0xd44   : > { %2833 = vst [vmem:[%s5501_s23 + $0x38] sm:$0xff] %v2791_v10 }
 0xd45   : > { %2831 = vst [vmem:[%s5501_s23 + $0x28] sm:$0xff] %v2783_v17 }
 0xd47   : > { %v3539_v48 = vpop.f32.mrb[72].mxu1 }
 0xd48   : > { %v2804_v45 = vadd.f32 %v3539_v48, %v3049_v1  ;;  %v2795_v13 = vpop.f32.mrb[73].mxu1 }
 0xd49   : > { %v2796_v46 = vadd.f32 %v3049_v1, %v2795_v13  ;;  %v3540_v60 = vpop.f32.mrb[74].mxu1 }
 0xd4a   : > { %2836 = vst [vmem:[%s5501_s23 + $0x50] sm:$0xff] %v2804_v45  ;;  %v2807_v54 = vadd.f32 %v3540_v60, %v3049_v1  ;;  %v2798_v59 = vpop.f32.mrb[75].mxu1 }
 0xd4b   : > { %2834 = vst [vmem:[%s5501_s23 + $0x40] sm:$0xff] %v2796_v46  ;;  %v2799_v31 = vadd.f32 %v3049_v1, %v2798_v59 }
 0xd4c   : > { %2837 = vst [vmem:[%s5501_s23 + $0x58] sm:$0xff] %v2807_v54 }
 0xd4d   : > { %2835 = vst [vmem:[%s5501_s23 + $0x48] sm:$0xff] %v2799_v31 }
 0xd73   : > { %v3543_v16 = vpop.f32.mrb[76].mxu1 }
 0xd74   : > { %v2820_v23 = vadd.f32 %v3543_v16, %v3049_v1  ;;  %v2811_v0 = vpop.f32.mrb[77].mxu1 }
 0xd75   : > { %v2812_v7 = vadd.f32 %v3049_v1, %v2811_v0  ;;  %v3544_v57 = vpop.f32.mrb[78].mxu1 }
 0xd76   : > { %2840 = vst [vmem:[%s5501_s23 + $0x70] sm:$0xff] %v2820_v23  ;;  %v2823_v2 = vadd.f32 %v3544_v57, %v3049_v1  ;;  %v2814_v34 = vpop.f32.mrb[79].mxu1 }
 0xd77   : > { %2838 = vst [vmem:[%s5501_s23 + $0x60] sm:$0xff] %v2812_v7  ;;  %v2815_v49 = vadd.f32 %v3049_v1, %v2814_v34 }
 0xd78   : > { %2841 = vst [vmem:[%s5501_s23 + $0x78] sm:$0xff] %v2823_v2 }
 0xd79   : > { %2839 = vst [vmem:[%s5501_s23 + $0x68] sm:$0xff] %v2815_v49 }
 0xd7a   : > { %4138 = shalt.err (!%p4135_p13)
}
 0xd7b   : > { %s4139_s11 = scalar_lea.hbm %s5521_s21, 2048  ;;  %s4143_s12 = scalar_lea.hbm %s5577_s7, 4096 }
 0xd7c   : > { %p4140_p9 = scmp.ne.s32.totalorder %s5521_s21, %s4139_s11  ;;  %p4144_p4 = scmp.lt.u32.totalorder %s5521_s21, %s5577_s7 }
 0xd7d   : > { %p4145_p8 = scmp.lt.u32.totalorder %s4143_s12, %s4139_s11  ;;  %p4147_p3 = scmp.lt.u32.totalorder %s4139_s11, %s5521_s21 }
 0xd7e   : > { %p4141_p0 = pnand %p4140_p9, %p4425_p10 }
 0xd7f   : > { %p4146_p6 = por %p4145_p8, %p4144_p4 }
 0xd80   : > { %p4142_p11 = pneg %p4141_p0 }
 0xd81   : > { %p4148_p5 = por %p4147_p3, %p4146_p6 }
 0xd83   : > { %p4149_p7 = pnand %p4148_p5, %p4142_p11 }
 0xd85   : > { %4152 = shalt.err (!%p4149_p7)
}
 0xd86   : > { %s4212_s29 = smov 128   ;;  %s4213_s16 = smov 8  }
 0xd87   : > { %3595 = dma.vmem_to_hbm [thread:$0]  (%p4425_p10), %s5523_s10, 2048, %s5521_s21, %s2843_s28, %s4212_s29, %s4212_s29, %s4213_s16  }
 0xd88 PF: > { %s5616_s30 = sld [smem:[#allocation17_spill]]  ;;  %s2871_s9 = sand.u32 1, %s4187_s24  }
 0xd89   : > { %p5618_p1 = scmp.ge.s32.totalorder %s4199_s27, 2  ;;  %s2872_s13 = scalar_lea.sflag [#allocation5], %s2871_s9 }
 0xd8e   : > { %p5617_p12 = scmp.ne.s32.totalorder %s5616_s30, 0 }
 0xd90   : > { %p3615_p2 = pnand %p5618_p1, %p5617_p12 }
 0xd92   : > { %4182 = dma.done.wait (!%p3615_p2), %s2872_s13, 2048  }
 0xd93   : > { %4184 = vsyncadd (!%p3615_p2), %s2872_s13, 4294965248  ;;  %p22_p13 = scmp.ge.s32.totalorder %s4415_s22, 4   ;;  %s5619_s24 = smov %s4191_s25 }
 0xd94   : > { %s5620_s25 = smov %s4195_s26  ;;  %s5621_s26 = smov %s4431_s20 }
 0xd95   : > { %s5622_s27 = smov %s4415_s22  ;;  %24 = sbr.rel (!%p22_p13) target bundleno = 7 (0x7), region = 109 }
 0xd9c   :  { %2877 = vsyncpa [#allocation4], 1 }
 0xd9d   :  { %2879 = vsyncpa [#allocation4 + $0x1], 1 }
 0xd9e   :  { %2880 = vsyncpa [#allocation7], 1 }
 0xd9f   :  { %2881 = vsyncpa [#allocation10], 1 }
 0xda0   :  { %2882 = vsyncpa [#allocation5], 1 }
 0xda1   :  { %2884 = vsyncpa [#allocation5 + $0x1], 1 }

</bundles_post_ra>
